<compile_context>
chip_gen: v6e
topology: v6e:2x2x1
jax: 0.10.0
libtpu: 0.0.40
codegen_flags: <defaults>
</compile_context>

<pallas_src>
import functools
import math

import jax
import jax.numpy as jnp
from jax import lax
from jax.experimental import pallas as pl
from jax.experimental.pallas import tpu as pltpu

NEG_INF = -1e30  # large finite negative: same softmax result as -inf, no NaN rows


def _ru(x, m):
    return ((x + m - 1) // m) * m


def _layer_norm(y, g, b, eps):
    mean = jnp.mean(y, axis=-1, keepdims=True)
    cent = y - mean
    var = jnp.mean(cent * cent, axis=-1, keepdims=True)
    return cent * lax.rsqrt(var + eps) * g + b


# ----------------------- fused encoder-layer kernel --------------------------

def _encoder_layer_kernel(x_ref, srel_ref, pad_ref, chord_ref,
                          wqkv_ref, bqkv_ref, wo_ref, bo_ref,
                          g1_ref, be1_ref, w1_ref, b1_ref,
                          w2_ref, b2_ref, g2_ref, be2_ref,
                          o_ref, *, num_heads, dh, seq_len, eps):
    S = seq_len
    E = num_heads * dh
    inv_sqrt_dh = 1.0 / math.sqrt(dh)

    x = x_ref[0]                               # (S, E) f32
    x_bf = x.astype(jnp.bfloat16)
    pad_add = pad_ref[0]                       # (1, S) additive pad mask (0/NEG)

    # causal part of the mask generated in-kernel (no (B,S,S) HBM tensor) and
    # folded directly into the logits.
    row = lax.broadcasted_iota(jnp.int32, (S, S), 0)
    col = lax.broadcasted_iota(jnp.int32, (S, S), 1)
    causal = col > row

    # ---- relative global attention (per-head loop, bf16 MXU, f32 acc) ----
    # out-projection is folded into the head loop:  concat_h(out_h) @ Wo
    #                                            == sum_h out_h @ Wo[h]
    y = jnp.zeros((S, E), jnp.float32)
    for h in range(num_heads):
        q = (jnp.dot(x_bf, wqkv_ref[h], preferred_element_type=jnp.float32)
             + bqkv_ref[h]).astype(jnp.bfloat16)                        # (S, dh)
        k = (jnp.dot(x_bf, wqkv_ref[num_heads + h],
                     preferred_element_type=jnp.float32)
             + bqkv_ref[num_heads + h]).astype(jnp.bfloat16)            # (S, dh)
        v = (jnp.dot(x_bf, wqkv_ref[2 * num_heads + h],
                     preferred_element_type=jnp.float32)
             + bqkv_ref[2 * num_heads + h]).astype(jnp.bfloat16)        # (S, dh)

        qkt = lax.dot_general(q, k, (((1,), (1,)), ((), ())),
                              preferred_element_type=jnp.float32)       # (S, S)
        logits = jnp.where(causal, NEG_INF,
                           (qkt + srel_ref[h]) * inv_sqrt_dh) + pad_add
        mx = jnp.max(logits, axis=-1, keepdims=True)
        p = jnp.exp(logits - mx)
        attn_w = p * pl.reciprocal(jnp.sum(p, axis=-1, keepdims=True),
                                   approx=True)
        out_h = jnp.dot(attn_w.astype(jnp.bfloat16), v,
                        preferred_element_type=jnp.float32)             # (S, dh)
        y = y + jnp.dot(out_h.astype(jnp.bfloat16), wo_ref[h],
                        preferred_element_type=jnp.float32)             # (S, E)

    # output-projection bias + residual + LayerNorm1
    y = y + bo_ref[...] + x
    out1 = _layer_norm(y, g1_ref[...], be1_ref[...], eps)               # (S, E)

    # FFN_pre + ReLU + chord add (use_chords=True, chord_insertion='add')
    hmid = jnp.maximum(
        jnp.dot(out1.astype(jnp.bfloat16), w1_ref[...],
                preferred_element_type=jnp.float32) + b1_ref[...], 0.0)
    hmid = hmid + chord_ref[0]                                          # (S, D)

    # FFN_suf + residual + LayerNorm2
    y2 = jnp.dot(hmid.astype(jnp.bfloat16), w2_ref[...],
                 preferred_element_type=jnp.float32) + b2_ref[...] + out1
    o_ref[0] = _layer_norm(y2, g2_ref[...], be2_ref[...], eps)


def encoder_layer(x, pad_add, chord, lp, cfg):
    """x: (B, S, E) f32; pad_add: (B, 1, S) f32; chord: (B, S, D) f32."""
    B, S, E = x.shape
    H = cfg["num_head"]
    dh = E // H
    D = cfg["d_inner"]
    max_seq = cfg["max_seq"]
    assert S <= max_seq, f"sequence length {S} exceeds max_seq {max_seq}"

    # ---- Srel (exact PyTorch _qe_masking + skew), computed as XLA glue ----
    # QE = einsum('bhld,md->bhlm', Wq(x), e) folds into a per-head table
    # P_h = Wq_h @ e^T, so no separate Q projection is materialized here.
    e = lp["E"][max_seq - S:, :]                                    # (S, dh)
    P = jnp.einsum('hed,sd->hes', lp["wq_f32"], e)                  # (H, E, S)
    c = jnp.einsum('hd,sd->hs', lp["bq_f32"], e)                    # (H, S)
    qe = jnp.einsum('bie,hes->bhis', x, P) + c[None, :, None, :]    # (B,H,S,S)
    l_idx = jnp.arange(S)[:, None]
    m_idx = jnp.arange(S)[None, :]
    qe = jnp.where(m_idx >= S - 1 - l_idx, qe, 0.0)                 # _qe_masking
    padded = jnp.pad(qe, ((0, 0), (0, 0), (0, 0), (1, 0)))
    srel = padded.reshape(B, H, S + 1, S)[:, :, 1:, :]              # _skewing
    srel = srel.reshape(B * H, S, S).astype(jnp.float32)
    # TODO(synk): at large S compute Srel inside a q-tiled flash-style kernel
    # instead of materializing the (B,H,S,S) tensor.

    kern = functools.partial(_encoder_layer_kernel, num_heads=H, dh=dh,
                             seq_len=S, eps=1e-6)
    zero2 = lambda b: (0, 0)
    zero3 = lambda b: (0, 0, 0)

    return pl.pallas_call(
        kern,
        out_shape=jax.ShapeDtypeStruct((B, S, E), jnp.float32),
        grid=(B,),
        in_specs=[
            pl.BlockSpec((1, S, E), lambda b: (b, 0, 0)),        # x
            pl.BlockSpec((H, S, S), lambda b: (b, 0, 0)),        # srel (this batch's heads)
            pl.BlockSpec((1, 1, S), lambda b: (b, 0, 0)),        # pad_add
            pl.BlockSpec((1, S, D), lambda b: (b, 0, 0)),        # chord
            pl.BlockSpec((3 * H, E, dh), zero3),                 # wqkv (bf16)
            pl.BlockSpec((3 * H, 1, dh), zero3),                 # bqkv
            pl.BlockSpec((H, dh, E), zero3),                     # wo (bf16)
            pl.BlockSpec((1, E), zero2),                         # bo
            pl.BlockSpec((1, E), zero2),                         # ln1 gamma
            pl.BlockSpec((1, E), zero2),                         # ln1 beta
            pl.BlockSpec((E, D), zero2),                         # ffn_w1 (bf16)
            pl.BlockSpec((1, D), zero2),                         # ffn_b1
            pl.BlockSpec((D, E), zero2),                         # ffn_w2 (bf16)
            pl.BlockSpec((1, E), zero2),                         # ffn_b2
            pl.BlockSpec((1, E), zero2),                         # ln2 gamma
            pl.BlockSpec((1, E), zero2),                         # ln2 beta
        ],
        out_specs=pl.BlockSpec((1, S, E), lambda b: (b, 0, 0)),
        compiler_params=pltpu.CompilerParams(
            dimension_semantics=("parallel",),
            vmem_limit_bytes=32 * 1024 * 1024),
    )(x, srel, pad_add, chord,
      lp["wqkv"], lp["bqkv"], lp["wo"], lp["bo"],
      lp["ln1_g"], lp["ln1_b"], lp["ffn_w1"], lp["ffn_b1"],
      lp["ffn_w2"], lp["ffn_b2"], lp["ln2_g"], lp["ln2_b"])


# --------------------------- tiled matmul (+bias) -----------------------------

def _matmul_bias_kernel(x_ref, w_ref, b_ref, o_ref, acc_ref):
    k = pl.program_id(2)

    @pl.when(k == 0)
    def _():
        acc_ref[...] = jnp.zeros_like(acc_ref)

    acc_ref[...] += jnp.dot(x_ref[...], w_ref[...],
                            preferred_element_type=jnp.float32)

    @pl.when(k == pl.num_programs(2) - 1)
    def _():
        o_ref[...] = (acc_ref[...] + b_ref[...]).astype(o_ref.dtype)


def matmul_bias(x, w, b, *, tm_max=256, tn_max=512, tk_max=512):
    """y = x @ w + b  (bf16 operands, f32 accumulation).  Used once, for the
    final vocab projection, so its pad/slice happens once per forward.
    # TODO(synk): per-generation tile / vmem_limit tuning (larger on v5e/v6e).
    """
    M, K = x.shape
    _, N = w.shape

    tm = min(tm_max, _ru(M, 8))
    Mp = _ru(M, tm)
    tk = min(tk_max, _ru(K, 128))
    Kp = _ru(K, tk)
    tn = min(tn_max, _ru(N, 128))
    Np = _ru(N, tn)

    def pad2(a, r, cdim):
        rr, cc = a.shape
        if rr == r and cc == cdim:
            return a
        return jnp.pad(a, ((0, r - rr), (0, cdim - cc)))

    xb = pad2(x.astype(jnp.bfloat16), Mp, Kp)
    wb = pad2(w.astype(jnp.bfloat16), Kp, Np)
    bb = pad2(b.reshape(1, N).astype(jnp.float32), 1, Np)

    out = pl.pallas_call(
        _matmul_bias_kernel,
        out_shape=jax.ShapeDtypeStruct((Mp, Np), jnp.float32),
        grid=(Mp // tm, Np // tn, Kp // tk),
        in_specs=[pl.BlockSpec((tm, tk), lambda i, j, k: (i, k)),
                  pl.BlockSpec((tk, tn), lambda i, j, k: (k, j)),
                  pl.BlockSpec((1, tn), lambda i, j, k: (0, j))],
        out_specs=pl.BlockSpec((tm, tn), lambda i, j, k: (i, j)),
        scratch_shapes=[pltpu.VMEM((tm, tn), jnp.float32)],
        compiler_params=pltpu.CompilerParams(
            dimension_semantics=("parallel", "parallel", "arbitrary"),
            vmem_limit_bytes=32 * 1024 * 1024),
    )(xb, wb, bb)
    return out[:M, :N]


# ------------------------------- model glue ----------------------------------

def music_transformer_forward(params, x_tokens, conditions, times_to_chord, cfg):
    B, S0 = x_tokens.shape
    E = cfg["embedding_dim"]
    n_cond = cfg["n_conditions"]
    D = cfg["d_inner"]
    pad_token = cfg["pad_token"]
    S = S0 + n_cond

    # token embedding * sqrt(E)   (gather: plain JAX glue)
    x = params["embedding"][x_tokens] * math.sqrt(E)               # (B, S0, E)

    # pad indicator row for the condition-extended sequence; the causal part of
    # the attention mask is generated from iota inside the kernel.
    xp = jnp.concatenate(
        [jnp.full((B, n_cond), -1, dtype=x_tokens.dtype), x_tokens], axis=1)
    pad_add = jnp.where(xp == pad_token, NEG_INF, 0.0)
    pad_add = pad_add.astype(jnp.float32).reshape(B, 1, S)

    # condition encoders (tiny B x 1 MLPs; plain JAX glue)
    conds = []
    for i in range(n_cond):
        c = conditions[:, i:i + 1]                                 # (B, 1)
        nan_mask = jnp.isnan(c)
        masked = jnp.where(nan_mask, 0.0, c)
        p = params["fc_conditions"][i]
        h1 = jax.nn.relu(masked @ p["w1"] + p["b1"])
        h2 = h1 @ p["w2"] + p["b2"]                                # (B, E)
        conds.append(jnp.where(nan_mask, params["null_conditions"][i], h2))
    cond_enc = jnp.stack(conds, axis=1)                            # (B, n_cond, E)
    x = jnp.concatenate([cond_enc, x], axis=1)                     # (B, S, E)

    # times_to_chord padding (the reference hardcodes a repeat of 2 == n_cond)
    padding = jnp.repeat(times_to_chord[:, 0:1], n_cond, axis=1)
    ttc = jnp.concatenate([padding, times_to_chord], axis=1)       # (B, S)

    pos = params["positional_encoding"][:, :S, :]                  # (1, S, E)
    # use_chords=True, chord_insertion='add': chord offset goes into every FFN
    chord = (8.0 - ttc)[..., None] * params["chord_w"].reshape(1, 1, D) \
        + params["chord_b"].reshape(1, 1, D)                       # (B, S, D)

    x = x + pos
    # dropout -> identity (inference)

    for lp in params["layers"]:
        x = encoder_layer(x, pad_add, chord, lp, cfg)

    logits = matmul_bias(x.reshape(B * S, E), params["fc_w"], params["fc_b"])
    return logits.reshape(B, S, cfg["vocab_size"])


# ----------------------------- parameter init --------------------------------

def init_params(key, cfg):
    E = cfg["embedding_dim"]
    D = cfg["d_inner"]
    V = cfg["vocab_size"]
    H = cfg["num_head"]
    dh = E // H
    L = cfg["num_layer"]
    M = cfg["max_seq"]
    n_cond = cfg["n_conditions"]

    keys = iter(jax.random.split(key, 256))

    def u(shape, s=0.1):
        return jax.random.uniform(next(keys), shape, jnp.float32, -s, s)

    params = {
        "embedding": u((V, E)),
        "positional_encoding": u((1, M, E)),
        "chord_w": u((D,)),                     # ff_times_to_chord: Linear(1, D)
        "chord_b": jnp.zeros((D,), jnp.float32),
        "fc_conditions": [
            {"w1": u((1, E // 2)), "b1": jnp.zeros((E // 2,), jnp.float32),
             "w2": u((E // 2, E)), "b2": jnp.zeros((E,), jnp.float32)}
            for _ in range(n_cond)],
        "null_conditions": [u((1, E)) for _ in range(n_cond)],
        "fc_w": u((E, V)),
        "fc_b": jnp.zeros((V,), jnp.float32),
        "layers": [],
    }
    for _ in range(L):
        params["layers"].append({
            "wqkv": u((3, H, E, dh)),           # per-head Wq / Wk / Wv stacks
            "bqkv": jnp.zeros((3, H, dh), jnp.float32),
            "wo": u((H, dh, E)),                # per-head slices of the fc proj
            "bo": jnp.zeros((E,), jnp.float32),
            "E": u((M, dh), 1.0),               # relative position embeddings
            "ffn_w1": u((E, D)), "ffn_b1": jnp.zeros((D,), jnp.float32),
            "ffn_w2": u((D, E)), "ffn_b2": jnp.zeros((E,), jnp.float32),
            "ln1_g": jnp.ones((E,), jnp.float32), "ln1_b": jnp.zeros((E,), jnp.float32),
            "ln2_g": jnp.ones((E,), jnp.float32), "ln2_b": jnp.zeros((E,), jnp.float32),
        })
    return params


def prepare_params(params, cfg):
    """One-time cast of kernel-consumed weights to bf16 and bias/LN reshape to
    (1, N); keeps f32 masters of Wq/bq for the (XLA-side) Srel table fold."""
    E = cfg["embedding_dim"]
    D = cfg["d_inner"]
    H = cfg["num_head"]
    dh = E // H

    out = {
        "embedding": params["embedding"],
        "positional_encoding": params["positional_encoding"],
        "chord_w": params["chord_w"],
        "chord_b": params["chord_b"],
        "fc_conditions": params["fc_conditions"],
        "null_conditions": params["null_conditions"],
        "fc_w": params["fc_w"].astype(jnp.bfloat16),
        "fc_b": params["fc_b"],
        "layers": [],
    }
    for lp in params["layers"]:
        out["layers"].append({
            "wqkv": lp["wqkv"].reshape(3 * H, E, dh).astype(jnp.bfloat16),
            "bqkv": lp["bqkv"].reshape(3 * H, 1, dh).astype(jnp.float32),
            "wq_f32": lp["wqkv"][0],            # (H, E, dh) for Srel fold
            "bq_f32": lp["bqkv"][0],            # (H, dh)
            "wo": lp["wo"].astype(jnp.bfloat16),
            "bo": lp["bo"].reshape(1, E),
            "E": lp["E"],
            "ffn_w1": lp["ffn_w1"].astype(jnp.bfloat16),
            "ffn_b1": lp["ffn_b1"].reshape(1, D),
            "ffn_w2": lp["ffn_w2"].astype(jnp.bfloat16),
            "ffn_b2": lp["ffn_b2"].reshape(1, E),
            "ln1_g": lp["ln1_g"].reshape(1, E), "ln1_b": lp["ln1_b"].reshape(1, E),
            "ln2_g": lp["ln2_g"].reshape(1, E), "ln2_b": lp["ln2_b"].reshape(1, E),
        })
    return out


# ---------------------------------- main --------------------------------------

if __name__ == "__main__":
    cfg = dict(embedding_dim=32, d_inner=64, vocab_size=40, num_layer=2,
               num_head=4, max_seq=16, pad_token=0, n_conditions=2)

    key = jax.random.PRNGKey(0)
    k_params, k_tok, k_cond, k_ttc = jax.random.split(key, 4)
    params = init_params(k_params, cfg)
    kparams = prepare_params(params, cfg)

    B, S0 = 2, 8
    x_tokens = jax.random.randint(k_tok, (B, S0), 1, cfg["vocab_size"])
    x_tokens = x_tokens.at[0, -1].set(cfg["pad_token"])          # exercise padding
    conditions = jax.random.uniform(k_cond, (B, cfg["n_conditions"]),
                                    jnp.float32, 0.0, 4.0)
    conditions = conditions.at[1, 0].set(jnp.nan)                # exercise null cond
    times_to_chord = jax.random.uniform(k_ttc, (B, S0), jnp.float32, 0.0, 8.0)

    fwd = jax.jit(functools.partial(music_transformer_forward, cfg=cfg))
    out = fwd(kparams, x_tokens, conditions, times_to_chord)
    out = jax.block_until_ready(out)

    assert out.shape == (B, S0 + cfg["n_conditions"], cfg["vocab_size"]), out.shape
    assert bool(jnp.all(jnp.isfinite(out)))
    print("KERNEL_OK")
</pallas_src>

<mosaic_0001>
module attributes {stable_mosaic.version = 11 : i64} {
  func.func @_encoder_layer_kernel(%arg0: i32, %arg1: memref<1x10x32xf32, #tpu.memory_space<vmem>>, %arg2: memref<4x10x10xf32, #tpu.memory_space<vmem>>, %arg3: memref<1x1x10xf32, #tpu.memory_space<vmem>>, %arg4: memref<1x10x64xf32, #tpu.memory_space<vmem>>, %arg5: memref<12x32x8xbf16, #tpu.memory_space<vmem>>, %arg6: memref<12x1x8xf32, #tpu.memory_space<vmem>>, %arg7: memref<4x8x32xbf16, #tpu.memory_space<vmem>>, %arg8: memref<1x32xf32, #tpu.memory_space<vmem>>, %arg9: memref<1x32xf32, #tpu.memory_space<vmem>>, %arg10: memref<1x32xf32, #tpu.memory_space<vmem>>, %arg11: memref<32x64xbf16, #tpu.memory_space<vmem>>, %arg12: memref<1x64xf32, #tpu.memory_space<vmem>>, %arg13: memref<64x32xbf16, #tpu.memory_space<vmem>>, %arg14: memref<1x32xf32, #tpu.memory_space<vmem>>, %arg15: memref<1x32xf32, #tpu.memory_space<vmem>>, %arg16: memref<1x32xf32, #tpu.memory_space<vmem>>, %arg17: memref<1x10x32xf32, #tpu.memory_space<vmem>>) attributes {dimension_semantics = [#tpu.dimension_semantics<parallel>], iteration_bounds = array<i64: 2>, scalar_prefetch = 0 : i64, scratch_operands = 0 : i64, tpu.core_type = #tpu.core_type<tc>, window_params = [{transform_indices = @transform_0, window_bounds = array<i64: 1, 10, 32>}, {transform_indices = @transform_1, window_bounds = array<i64: 4, 10, 10>}, {transform_indices = @transform_2, window_bounds = array<i64: 1, 1, 10>}, {transform_indices = @transform_3, window_bounds = array<i64: 1, 10, 64>}, {pipeline_mode = #tpu.pipeline_mode<synchronous>, transform_indices = @transform_4, window_bounds = array<i64: 12, 32, 8>}, {pipeline_mode = #tpu.pipeline_mode<synchronous>, transform_indices = @transform_5, window_bounds = array<i64: 12, 1, 8>}, {pipeline_mode = #tpu.pipeline_mode<synchronous>, transform_indices = @transform_6, window_bounds = array<i64: 4, 8, 32>}, {pipeline_mode = #tpu.pipeline_mode<synchronous>, transform_indices = @transform_7, window_bounds = array<i64: 1, 32>}, {pipeline_mode = #tpu.pipeline_mode<synchronous>, transform_indices = @transform_8, window_bounds = array<i64: 1, 32>}, {pipeline_mode = #tpu.pipeline_mode<synchronous>, transform_indices = @transform_9, window_bounds = array<i64: 1, 32>}, {pipeline_mode = #tpu.pipeline_mode<synchronous>, transform_indices = @transform_10, window_bounds = array<i64: 32, 64>}, {pipeline_mode = #tpu.pipeline_mode<synchronous>, transform_indices = @transform_11, window_bounds = array<i64: 1, 64>}, {pipeline_mode = #tpu.pipeline_mode<synchronous>, transform_indices = @transform_12, window_bounds = array<i64: 64, 32>}, {pipeline_mode = #tpu.pipeline_mode<synchronous>, transform_indices = @transform_13, window_bounds = array<i64: 1, 32>}, {pipeline_mode = #tpu.pipeline_mode<synchronous>, transform_indices = @transform_14, window_bounds = array<i64: 1, 32>}, {pipeline_mode = #tpu.pipeline_mode<synchronous>, transform_indices = @transform_15, window_bounds = array<i64: 1, 32>}, {transform_indices = @transform_16, window_bounds = array<i64: 1, 10, 32>}]} {
    %c0 = arith.constant 0 : index
    %c0_0 = arith.constant 0 : index
    %c0_1 = arith.constant 0 : index
    %0 = vector.load %arg1[%c0, %c0_0, %c0_1] : memref<1x10x32xf32, #tpu.memory_space<vmem>>, vector<1x10x32xf32>
    %1 = vector.shape_cast %0 : vector<1x10x32xf32> to vector<10x32xf32>
    %2 = arith.truncf %1 : vector<10x32xf32> to vector<10x32xbf16>
    %c0_2 = arith.constant 0 : index
    %c0_3 = arith.constant 0 : index
    %c0_4 = arith.constant 0 : index
    %3 = vector.load %arg3[%c0_2, %c0_3, %c0_4] : memref<1x1x10xf32, #tpu.memory_space<vmem>>, vector<1x1x10xf32>
    %4 = vector.shape_cast %3 : vector<1x1x10xf32> to vector<1x10xf32>
    %5 = tpu.iota {dimensions = array<i32: 0>} : vector<10x10xi32>
    %6 = tpu.iota {dimensions = array<i32: 1>} : vector<10x10xi32>
    %7 = arith.cmpi sgt, %6, %5 : vector<10x10xi32>
    %cst = arith.constant 0.000000e+00 : f32
    %8 = vector.broadcast %cst : f32 to vector<10x32xf32>
    %c0_5 = arith.constant 0 : index
    %c0_6 = arith.constant 0 : index
    %c0_7 = arith.constant 0 : index
    %9 = vector.load %arg5[%c0_5, %c0_6, %c0_7] : memref<12x32x8xbf16, #tpu.memory_space<vmem>>, vector<1x32x8xbf16>
    %10 = vector.shape_cast %9 : vector<1x32x8xbf16> to vector<32x8xbf16>
    %cst_8 = arith.constant dense<0.000000e+00> : vector<10x8xf32>
    %11 = tpu.matmul %2, %10, %cst_8 {dimension_numbers = #tpu.dot_dimension_numbers<[1], [0], [0], [1], [0, 0, 1, 1], [], []>} : vector<10x32xbf16>, vector<32x8xbf16>, vector<10x8xf32> -> vector<10x8xf32>
    %c0_9 = arith.constant 0 : index
    %c0_10 = arith.constant 0 : index
    %c0_11 = arith.constant 0 : index
    %12 = vector.load %arg6[%c0_9, %c0_10, %c0_11] : memref<12x1x8xf32, #tpu.memory_space<vmem>>, vector<1x1x8xf32>
    %13 = vector.shape_cast %12 : vector<1x1x8xf32> to vector<1x8xf32>
    %14 = vector.broadcast %13 : vector<1x8xf32> to vector<10x8xf32>
    %15 = arith.addf %11, %14 : vector<10x8xf32>
    %16 = arith.truncf %15 : vector<10x8xf32> to vector<10x8xbf16>
    %c4 = arith.constant 4 : index
    %c0_12 = arith.constant 0 : index
    %c0_13 = arith.constant 0 : index
    %17 = vector.load %arg5[%c4, %c0_12, %c0_13] : memref<12x32x8xbf16, #tpu.memory_space<vmem>>, vector<1x32x8xbf16>
    %18 = vector.shape_cast %17 : vector<1x32x8xbf16> to vector<32x8xbf16>
    %cst_14 = arith.constant dense<0.000000e+00> : vector<10x8xf32>
    %19 = tpu.matmul %2, %18, %cst_14 {dimension_numbers = #tpu.dot_dimension_numbers<[1], [0], [0], [1], [0, 0, 1, 1], [], []>} : vector<10x32xbf16>, vector<32x8xbf16>, vector<10x8xf32> -> vector<10x8xf32>
    %c4_15 = arith.constant 4 : index
    %c0_16 = arith.constant 0 : index
    %c0_17 = arith.constant 0 : index
    %20 = vector.load %arg6[%c4_15, %c0_16, %c0_17] : memref<12x1x8xf32, #tpu.memory_space<vmem>>, vector<1x1x8xf32>
    %21 = vector.shape_cast %20 : vector<1x1x8xf32> to vector<1x8xf32>
    %22 = vector.broadcast %21 : vector<1x8xf32> to vector<10x8xf32>
    %23 = arith.addf %19, %22 : vector<10x8xf32>
    %24 = arith.truncf %23 : vector<10x8xf32> to vector<10x8xbf16>
    %c8 = arith.constant 8 : index
    %c0_18 = arith.constant 0 : index
    %c0_19 = arith.constant 0 : index
    %25 = vector.load %arg5[%c8, %c0_18, %c0_19] : memref<12x32x8xbf16, #tpu.memory_space<vmem>>, vector<1x32x8xbf16>
    %26 = vector.shape_cast %25 : vector<1x32x8xbf16> to vector<32x8xbf16>
    %cst_20 = arith.constant dense<0.000000e+00> : vector<10x8xf32>
    %27 = tpu.matmul %2, %26, %cst_20 {dimension_numbers = #tpu.dot_dimension_numbers<[1], [0], [0], [1], [0, 0, 1, 1], [], []>} : vector<10x32xbf16>, vector<32x8xbf16>, vector<10x8xf32> -> vector<10x8xf32>
    %c8_21 = arith.constant 8 : index
    %c0_22 = arith.constant 0 : index
    %c0_23 = arith.constant 0 : index
    %28 = vector.load %arg6[%c8_21, %c0_22, %c0_23] : memref<12x1x8xf32, #tpu.memory_space<vmem>>, vector<1x1x8xf32>
    %29 = vector.shape_cast %28 : vector<1x1x8xf32> to vector<1x8xf32>
    %30 = vector.broadcast %29 : vector<1x8xf32> to vector<10x8xf32>
    %31 = arith.addf %27, %30 : vector<10x8xf32>
    %32 = arith.truncf %31 : vector<10x8xf32> to vector<10x8xbf16>
    %cst_24 = arith.constant dense<0.000000e+00> : vector<10x10xf32>
    %33 = tpu.matmul %16, %24, %cst_24 {dimension_numbers = #tpu.dot_dimension_numbers<[1], [1], [0], [0], [0, 0, 1, 0], [], []>} : vector<10x8xbf16>, vector<10x8xbf16>, vector<10x10xf32> -> vector<10x10xf32>
    %c0_25 = arith.constant 0 : index
    %c0_26 = arith.constant 0 : index
    %c0_27 = arith.constant 0 : index
    %34 = vector.load %arg2[%c0_25, %c0_26, %c0_27] : memref<4x10x10xf32, #tpu.memory_space<vmem>>, vector<1x10x10xf32>
    %35 = vector.shape_cast %34 : vector<1x10x10xf32> to vector<10x10xf32>
    %36 = arith.addf %33, %35 : vector<10x10xf32>
    %cst_28 = arith.constant 0.353553385 : f32
    %37 = vector.broadcast %cst_28 : f32 to vector<10x10xf32>
    %38 = arith.mulf %36, %37 : vector<10x10xf32>
    %cst_29 = arith.constant -1.000000e+30 : f32
    %39 = vector.broadcast %cst_29 : f32 to vector<10x10xf32>
    %40 = arith.select %7, %39, %38 : vector<10x10xi1>, vector<10x10xf32>
    %41 = vector.broadcast %4 : vector<1x10xf32> to vector<10x10xf32>
    %42 = arith.addf %40, %41 : vector<10x10xf32>
    %cst_30 = arith.constant dense<0xFF800000> : vector<10xf32>
    %43 = vector.multi_reduction <maximumf>, %42, %cst_30 [1] : vector<10x10xf32> to vector<10xf32>
    %44 = vector.shape_cast %43 : vector<10xf32> to vector<10x1xf32>
    %45 = vector.broadcast %44 : vector<10x1xf32> to vector<10x10xf32>
    %46 = arith.subf %42, %45 : vector<10x10xf32>
    %47 = math.exp %46 : vector<10x10xf32>
    %cst_31 = arith.constant dense<0.000000e+00> : vector<10xf32>
    %48 = vector.multi_reduction <add>, %47, %cst_31 [1] : vector<10x10xf32> to vector<10xf32>
    %49 = vector.shape_cast %48 : vector<10xf32> to vector<10x1xf32>
    %50 = tpu.reciprocal %49 {approx = true} : vector<10x1xf32> -> vector<10x1xf32>
    %51 = vector.broadcast %50 : vector<10x1xf32> to vector<10x10xf32>
    %52 = arith.mulf %47, %51 : vector<10x10xf32>
    %53 = arith.truncf %52 : vector<10x10xf32> to vector<10x10xbf16>
    %cst_32 = arith.constant dense<0.000000e+00> : vector<10x8xf32>
    %54 = tpu.matmul %53, %32, %cst_32 {dimension_numbers = #tpu.dot_dimension_numbers<[1], [0], [0], [1], [0, 0, 1, 1], [], []>} : vector<10x10xbf16>, vector<10x8xbf16>, vector<10x8xf32> -> vector<10x8xf32>
    %55 = arith.truncf %54 : vector<10x8xf32> to vector<10x8xbf16>
    %c0_33 = arith.constant 0 : index
    %c0_34 = arith.constant 0 : index
    %c0_35 = arith.constant 0 : index
    %56 = vector.load %arg7[%c0_33, %c0_34, %c0_35] : memref<4x8x32xbf16, #tpu.memory_space<vmem>>, vector<1x8x32xbf16>
    %57 = vector.shape_cast %56 : vector<1x8x32xbf16> to vector<8x32xbf16>
    %cst_36 = arith.constant dense<0.000000e+00> : vector<10x32xf32>
    %58 = tpu.matmul %55, %57, %cst_36 {dimension_numbers = #tpu.dot_dimension_numbers<[1], [0], [0], [1], [0, 0, 1, 1], [], []>} : vector<10x8xbf16>, vector<8x32xbf16>, vector<10x32xf32> -> vector<10x32xf32>
    %59 = arith.addf %8, %58 : vector<10x32xf32>
    %c1 = arith.constant 1 : index
    %c0_37 = arith.constant 0 : index
    %c0_38 = arith.constant 0 : index
    %60 = vector.load %arg5[%c1, %c0_37, %c0_38] : memref<12x32x8xbf16, #tpu.memory_space<vmem>>, vector<1x32x8xbf16>
    %61 = vector.shape_cast %60 : vector<1x32x8xbf16> to vector<32x8xbf16>
    %cst_39 = arith.constant dense<0.000000e+00> : vector<10x8xf32>
    %62 = tpu.matmul %2, %61, %cst_39 {dimension_numbers = #tpu.dot_dimension_numbers<[1], [0], [0], [1], [0, 0, 1, 1], [], []>} : vector<10x32xbf16>, vector<32x8xbf16>, vector<10x8xf32> -> vector<10x8xf32>
    %c1_40 = arith.constant 1 : index
    %c0_41 = arith.constant 0 : index
    %c0_42 = arith.constant 0 : index
    %63 = vector.load %arg6[%c1_40, %c0_41, %c0_42] : memref<12x1x8xf32, #tpu.memory_space<vmem>>, vector<1x1x8xf32>
    %64 = vector.shape_cast %63 : vector<1x1x8xf32> to vector<1x8xf32>
    %65 = vector.broadcast %64 : vector<1x8xf32> to vector<10x8xf32>
    %66 = arith.addf %62, %65 : vector<10x8xf32>
    %67 = arith.truncf %66 : vector<10x8xf32> to vector<10x8xbf16>
    %c5 = arith.constant 5 : index
    %c0_43 = arith.constant 0 : index
    %c0_44 = arith.constant 0 : index
    %68 = vector.load %arg5[%c5, %c0_43, %c0_44] : memref<12x32x8xbf16, #tpu.memory_space<vmem>>, vector<1x32x8xbf16>
    %69 = vector.shape_cast %68 : vector<1x32x8xbf16> to vector<32x8xbf16>
    %cst_45 = arith.constant dense<0.000000e+00> : vector<10x8xf32>
    %70 = tpu.matmul %2, %69, %cst_45 {dimension_numbers = #tpu.dot_dimension_numbers<[1], [0], [0], [1], [0, 0, 1, 1], [], []>} : vector<10x32xbf16>, vector<32x8xbf16>, vector<10x8xf32> -> vector<10x8xf32>
    %c5_46 = arith.constant 5 : index
    %c0_47 = arith.constant 0 : index
    %c0_48 = arith.constant 0 : index
    %71 = vector.load %arg6[%c5_46, %c0_47, %c0_48] : memref<12x1x8xf32, #tpu.memory_space<vmem>>, vector<1x1x8xf32>
    %72 = vector.shape_cast %71 : vector<1x1x8xf32> to vector<1x8xf32>
    %73 = vector.broadcast %72 : vector<1x8xf32> to vector<10x8xf32>
    %74 = arith.addf %70, %73 : vector<10x8xf32>
    %75 = arith.truncf %74 : vector<10x8xf32> to vector<10x8xbf16>
    %c9 = arith.constant 9 : index
    %c0_49 = arith.constant 0 : index
    %c0_50 = arith.constant 0 : index
    %76 = vector.load %arg5[%c9, %c0_49, %c0_50] : memref<12x32x8xbf16, #tpu.memory_space<vmem>>, vector<1x32x8xbf16>
    %77 = vector.shape_cast %76 : vector<1x32x8xbf16> to vector<32x8xbf16>
    %cst_51 = arith.constant dense<0.000000e+00> : vector<10x8xf32>
    %78 = tpu.matmul %2, %77, %cst_51 {dimension_numbers = #tpu.dot_dimension_numbers<[1], [0], [0], [1], [0, 0, 1, 1], [], []>} : vector<10x32xbf16>, vector<32x8xbf16>, vector<10x8xf32> -> vector<10x8xf32>
    %c9_52 = arith.constant 9 : index
    %c0_53 = arith.constant 0 : index
    %c0_54 = arith.constant 0 : index
    %79 = vector.load %arg6[%c9_52, %c0_53, %c0_54] : memref<12x1x8xf32, #tpu.memory_space<vmem>>, vector<1x1x8xf32>
    %80 = vector.shape_cast %79 : vector<1x1x8xf32> to vector<1x8xf32>
    %81 = vector.broadcast %80 : vector<1x8xf32> to vector<10x8xf32>
    %82 = arith.addf %78, %81 : vector<10x8xf32>
    %83 = arith.truncf %82 : vector<10x8xf32> to vector<10x8xbf16>
    %cst_55 = arith.constant dense<0.000000e+00> : vector<10x10xf32>
    %84 = tpu.matmul %67, %75, %cst_55 {dimension_numbers = #tpu.dot_dimension_numbers<[1], [1], [0], [0], [0, 0, 1, 0], [], []>} : vector<10x8xbf16>, vector<10x8xbf16>, vector<10x10xf32> -> vector<10x10xf32>
    %c1_56 = arith.constant 1 : index
    %c0_57 = arith.constant 0 : index
    %c0_58 = arith.constant 0 : index
    %85 = vector.load %arg2[%c1_56, %c0_57, %c0_58] : memref<4x10x10xf32, #tpu.memory_space<vmem>>, vector<1x10x10xf32>
    %86 = vector.shape_cast %85 : vector<1x10x10xf32> to vector<10x10xf32>
    %87 = arith.addf %84, %86 : vector<10x10xf32>
    %cst_59 = arith.constant 0.353553385 : f32
    %88 = vector.broadcast %cst_59 : f32 to vector<10x10xf32>
    %89 = arith.mulf %87, %88 : vector<10x10xf32>
    %cst_60 = arith.constant -1.000000e+30 : f32
    %90 = vector.broadcast %cst_60 : f32 to vector<10x10xf32>
    %91 = arith.select %7, %90, %89 : vector<10x10xi1>, vector<10x10xf32>
    %92 = vector.broadcast %4 : vector<1x10xf32> to vector<10x10xf32>
    %93 = arith.addf %91, %92 : vector<10x10xf32>
    %cst_61 = arith.constant dense<0xFF800000> : vector<10xf32>
    %94 = vector.multi_reduction <maximumf>, %93, %cst_61 [1] : vector<10x10xf32> to vector<10xf32>
    %95 = vector.shape_cast %94 : vector<10xf32> to vector<10x1xf32>
    %96 = vector.broadcast %95 : vector<10x1xf32> to vector<10x10xf32>
    %97 = arith.subf %93, %96 : vector<10x10xf32>
    %98 = math.exp %97 : vector<10x10xf32>
    %cst_62 = arith.constant dense<0.000000e+00> : vector<10xf32>
    %99 = vector.multi_reduction <add>, %98, %cst_62 [1] : vector<10x10xf32> to vector<10xf32>
    %100 = vector.shape_cast %99 : vector<10xf32> to vector<10x1xf32>
    %101 = tpu.reciprocal %100 {approx = true} : vector<10x1xf32> -> vector<10x1xf32>
    %102 = vector.broadcast %101 : vector<10x1xf32> to vector<10x10xf32>
    %103 = arith.mulf %98, %102 : vector<10x10xf32>
    %104 = arith.truncf %103 : vector<10x10xf32> to vector<10x10xbf16>
    %cst_63 = arith.constant dense<0.000000e+00> : vector<10x8xf32>
    %105 = tpu.matmul %104, %83, %cst_63 {dimension_numbers = #tpu.dot_dimension_numbers<[1], [0], [0], [1], [0, 0, 1, 1], [], []>} : vector<10x10xbf16>, vector<10x8xbf16>, vector<10x8xf32> -> vector<10x8xf32>
    %106 = arith.truncf %105 : vector<10x8xf32> to vector<10x8xbf16>
    %c1_64 = arith.constant 1 : index
    %c0_65 = arith.constant 0 : index
    %c0_66 = arith.constant 0 : index
    %107 = vector.load %arg7[%c1_64, %c0_65, %c0_66] : memref<4x8x32xbf16, #tpu.memory_space<vmem>>, vector<1x8x32xbf16>
    %108 = vector.shape_cast %107 : vector<1x8x32xbf16> to vector<8x32xbf16>
    %cst_67 = arith.constant dense<0.000000e+00> : vector<10x32xf32>
    %109 = tpu.matmul %106, %108, %cst_67 {dimension_numbers = #tpu.dot_dimension_numbers<[1], [0], [0], [1], [0, 0, 1, 1], [], []>} : vector<10x8xbf16>, vector<8x32xbf16>, vector<10x32xf32> -> vector<10x32xf32>
    %110 = arith.addf %59, %109 : vector<10x32xf32>
    %c2 = arith.constant 2 : index
    %c0_68 = arith.constant 0 : index
    %c0_69 = arith.constant 0 : index
    %111 = vector.load %arg5[%c2, %c0_68, %c0_69] : memref<12x32x8xbf16, #tpu.memory_space<vmem>>, vector<1x32x8xbf16>
    %112 = vector.shape_cast %111 : vector<1x32x8xbf16> to vector<32x8xbf16>
    %cst_70 = arith.constant dense<0.000000e+00> : vector<10x8xf32>
    %113 = tpu.matmul %2, %112, %cst_70 {dimension_numbers = #tpu.dot_dimension_numbers<[1], [0], [0], [1], [0, 0, 1, 1], [], []>} : vector<10x32xbf16>, vector<32x8xbf16>, vector<10x8xf32> -> vector<10x8xf32>
    %c2_71 = arith.constant 2 : index
    %c0_72 = arith.constant 0 : index
    %c0_73 = arith.constant 0 : index
    %114 = vector.load %arg6[%c2_71, %c0_72, %c0_73] : memref<12x1x8xf32, #tpu.memory_space<vmem>>, vector<1x1x8xf32>
    %115 = vector.shape_cast %114 : vector<1x1x8xf32> to vector<1x8xf32>
    %116 = vector.broadcast %115 : vector<1x8xf32> to vector<10x8xf32>
    %117 = arith.addf %113, %116 : vector<10x8xf32>
    %118 = arith.truncf %117 : vector<10x8xf32> to vector<10x8xbf16>
    %c6 = arith.constant 6 : index
    %c0_74 = arith.constant 0 : index
    %c0_75 = arith.constant 0 : index
    %119 = vector.load %arg5[%c6, %c0_74, %c0_75] : memref<12x32x8xbf16, #tpu.memory_space<vmem>>, vector<1x32x8xbf16>
    %120 = vector.shape_cast %119 : vector<1x32x8xbf16> to vector<32x8xbf16>
    %cst_76 = arith.constant dense<0.000000e+00> : vector<10x8xf32>
    %121 = tpu.matmul %2, %120, %cst_76 {dimension_numbers = #tpu.dot_dimension_numbers<[1], [0], [0], [1], [0, 0, 1, 1], [], []>} : vector<10x32xbf16>, vector<32x8xbf16>, vector<10x8xf32> -> vector<10x8xf32>
    %c6_77 = arith.constant 6 : index
    %c0_78 = arith.constant 0 : index
    %c0_79 = arith.constant 0 : index
    %122 = vector.load %arg6[%c6_77, %c0_78, %c0_79] : memref<12x1x8xf32, #tpu.memory_space<vmem>>, vector<1x1x8xf32>
    %123 = vector.shape_cast %122 : vector<1x1x8xf32> to vector<1x8xf32>
    %124 = vector.broadcast %123 : vector<1x8xf32> to vector<10x8xf32>
    %125 = arith.addf %121, %124 : vector<10x8xf32>
    %126 = arith.truncf %125 : vector<10x8xf32> to vector<10x8xbf16>
    %c10 = arith.constant 10 : index
    %c0_80 = arith.constant 0 : index
    %c0_81 = arith.constant 0 : index
    %127 = vector.load %arg5[%c10, %c0_80, %c0_81] : memref<12x32x8xbf16, #tpu.memory_space<vmem>>, vector<1x32x8xbf16>
    %128 = vector.shape_cast %127 : vector<1x32x8xbf16> to vector<32x8xbf16>
    %cst_82 = arith.constant dense<0.000000e+00> : vector<10x8xf32>
    %129 = tpu.matmul %2, %128, %cst_82 {dimension_numbers = #tpu.dot_dimension_numbers<[1], [0], [0], [1], [0, 0, 1, 1], [], []>} : vector<10x32xbf16>, vector<32x8xbf16>, vector<10x8xf32> -> vector<10x8xf32>
    %c10_83 = arith.constant 10 : index
    %c0_84 = arith.constant 0 : index
    %c0_85 = arith.constant 0 : index
    %130 = vector.load %arg6[%c10_83, %c0_84, %c0_85] : memref<12x1x8xf32, #tpu.memory_space<vmem>>, vector<1x1x8xf32>
    %131 = vector.shape_cast %130 : vector<1x1x8xf32> to vector<1x8xf32>
    %132 = vector.broadcast %131 : vector<1x8xf32> to vector<10x8xf32>
    %133 = arith.addf %129, %132 : vector<10x8xf32>
    %134 = arith.truncf %133 : vector<10x8xf32> to vector<10x8xbf16>
    %cst_86 = arith.constant dense<0.000000e+00> : vector<10x10xf32>
    %135 = tpu.matmul %118, %126, %cst_86 {dimension_numbers = #tpu.dot_dimension_numbers<[1], [1], [0], [0], [0, 0, 1, 0], [], []>} : vector<10x8xbf16>, vector<10x8xbf16>, vector<10x10xf32> -> vector<10x10xf32>
    %c2_87 = arith.constant 2 : index
    %c0_88 = arith.constant 0 : index
    %c0_89 = arith.constant 0 : index
    %136 = vector.load %arg2[%c2_87, %c0_88, %c0_89] : memref<4x10x10xf32, #tpu.memory_space<vmem>>, vector<1x10x10xf32>
    %137 = vector.shape_cast %136 : vector<1x10x10xf32> to vector<10x10xf32>
    %138 = arith.addf %135, %137 : vector<10x10xf32>
    %cst_90 = arith.constant 0.353553385 : f32
    %139 = vector.broadcast %cst_90 : f32 to vector<10x10xf32>
    %140 = arith.mulf %138, %139 : vector<10x10xf32>
    %cst_91 = arith.constant -1.000000e+30 : f32
    %141 = vector.broadcast %cst_91 : f32 to vector<10x10xf32>
    %142 = arith.select %7, %141, %140 : vector<10x10xi1>, vector<10x10xf32>
    %143 = vector.broadcast %4 : vector<1x10xf32> to vector<10x10xf32>
    %144 = arith.addf %142, %143 : vector<10x10xf32>
    %cst_92 = arith.constant dense<0xFF800000> : vector<10xf32>
    %145 = vector.multi_reduction <maximumf>, %144, %cst_92 [1] : vector<10x10xf32> to vector<10xf32>
    %146 = vector.shape_cast %145 : vector<10xf32> to vector<10x1xf32>
    %147 = vector.broadcast %146 : vector<10x1xf32> to vector<10x10xf32>
    %148 = arith.subf %144, %147 : vector<10x10xf32>
    %149 = math.exp %148 : vector<10x10xf32>
    %cst_93 = arith.constant dense<0.000000e+00> : vector<10xf32>
    %150 = vector.multi_reduction <add>, %149, %cst_93 [1] : vector<10x10xf32> to vector<10xf32>
    %151 = vector.shape_cast %150 : vector<10xf32> to vector<10x1xf32>
    %152 = tpu.reciprocal %151 {approx = true} : vector<10x1xf32> -> vector<10x1xf32>
    %153 = vector.broadcast %152 : vector<10x1xf32> to vector<10x10xf32>
    %154 = arith.mulf %149, %153 : vector<10x10xf32>
    %155 = arith.truncf %154 : vector<10x10xf32> to vector<10x10xbf16>
    %cst_94 = arith.constant dense<0.000000e+00> : vector<10x8xf32>
    %156 = tpu.matmul %155, %134, %cst_94 {dimension_numbers = #tpu.dot_dimension_numbers<[1], [0], [0], [1], [0, 0, 1, 1], [], []>} : vector<10x10xbf16>, vector<10x8xbf16>, vector<10x8xf32> -> vector<10x8xf32>
    %157 = arith.truncf %156 : vector<10x8xf32> to vector<10x8xbf16>
    %c2_95 = arith.constant 2 : index
    %c0_96 = arith.constant 0 : index
    %c0_97 = arith.constant 0 : index
    %158 = vector.load %arg7[%c2_95, %c0_96, %c0_97] : memref<4x8x32xbf16, #tpu.memory_space<vmem>>, vector<1x8x32xbf16>
    %159 = vector.shape_cast %158 : vector<1x8x32xbf16> to vector<8x32xbf16>
    %cst_98 = arith.constant dense<0.000000e+00> : vector<10x32xf32>
    %160 = tpu.matmul %157, %159, %cst_98 {dimension_numbers = #tpu.dot_dimension_numbers<[1], [0], [0], [1], [0, 0, 1, 1], [], []>} : vector<10x8xbf16>, vector<8x32xbf16>, vector<10x32xf32> -> vector<10x32xf32>
    %161 = arith.addf %110, %160 : vector<10x32xf32>
    %c3 = arith.constant 3 : index
    %c0_99 = arith.constant 0 : index
    %c0_100 = arith.constant 0 : index
    %162 = vector.load %arg5[%c3, %c0_99, %c0_100] : memref<12x32x8xbf16, #tpu.memory_space<vmem>>, vector<1x32x8xbf16>
    %163 = vector.shape_cast %162 : vector<1x32x8xbf16> to vector<32x8xbf16>
    %cst_101 = arith.constant dense<0.000000e+00> : vector<10x8xf32>
    %164 = tpu.matmul %2, %163, %cst_101 {dimension_numbers = #tpu.dot_dimension_numbers<[1], [0], [0], [1], [0, 0, 1, 1], [], []>} : vector<10x32xbf16>, vector<32x8xbf16>, vector<10x8xf32> -> vector<10x8xf32>
    %c3_102 = arith.constant 3 : index
    %c0_103 = arith.constant 0 : index
    %c0_104 = arith.constant 0 : index
    %165 = vector.load %arg6[%c3_102, %c0_103, %c0_104] : memref<12x1x8xf32, #tpu.memory_space<vmem>>, vector<1x1x8xf32>
    %166 = vector.shape_cast %165 : vector<1x1x8xf32> to vector<1x8xf32>
    %167 = vector.broadcast %166 : vector<1x8xf32> to vector<10x8xf32>
    %168 = arith.addf %164, %167 : vector<10x8xf32>
    %169 = arith.truncf %168 : vector<10x8xf32> to vector<10x8xbf16>
    %c7 = arith.constant 7 : index
    %c0_105 = arith.constant 0 : index
    %c0_106 = arith.constant 0 : index
    %170 = vector.load %arg5[%c7, %c0_105, %c0_106] : memref<12x32x8xbf16, #tpu.memory_space<vmem>>, vector<1x32x8xbf16>
    %171 = vector.shape_cast %170 : vector<1x32x8xbf16> to vector<32x8xbf16>
    %cst_107 = arith.constant dense<0.000000e+00> : vector<10x8xf32>
    %172 = tpu.matmul %2, %171, %cst_107 {dimension_numbers = #tpu.dot_dimension_numbers<[1], [0], [0], [1], [0, 0, 1, 1], [], []>} : vector<10x32xbf16>, vector<32x8xbf16>, vector<10x8xf32> -> vector<10x8xf32>
    %c7_108 = arith.constant 7 : index
    %c0_109 = arith.constant 0 : index
    %c0_110 = arith.constant 0 : index
    %173 = vector.load %arg6[%c7_108, %c0_109, %c0_110] : memref<12x1x8xf32, #tpu.memory_space<vmem>>, vector<1x1x8xf32>
    %174 = vector.shape_cast %173 : vector<1x1x8xf32> to vector<1x8xf32>
    %175 = vector.broadcast %174 : vector<1x8xf32> to vector<10x8xf32>
    %176 = arith.addf %172, %175 : vector<10x8xf32>
    %177 = arith.truncf %176 : vector<10x8xf32> to vector<10x8xbf16>
    %c11 = arith.constant 11 : index
    %c0_111 = arith.constant 0 : index
    %c0_112 = arith.constant 0 : index
    %178 = vector.load %arg5[%c11, %c0_111, %c0_112] : memref<12x32x8xbf16, #tpu.memory_space<vmem>>, vector<1x32x8xbf16>
    %179 = vector.shape_cast %178 : vector<1x32x8xbf16> to vector<32x8xbf16>
    %cst_113 = arith.constant dense<0.000000e+00> : vector<10x8xf32>
    %180 = tpu.matmul %2, %179, %cst_113 {dimension_numbers = #tpu.dot_dimension_numbers<[1], [0], [0], [1], [0, 0, 1, 1], [], []>} : vector<10x32xbf16>, vector<32x8xbf16>, vector<10x8xf32> -> vector<10x8xf32>
    %c11_114 = arith.constant 11 : index
    %c0_115 = arith.constant 0 : index
    %c0_116 = arith.constant 0 : index
    %181 = vector.load %arg6[%c11_114, %c0_115, %c0_116] : memref<12x1x8xf32, #tpu.memory_space<vmem>>, vector<1x1x8xf32>
    %182 = vector.shape_cast %181 : vector<1x1x8xf32> to vector<1x8xf32>
    %183 = vector.broadcast %182 : vector<1x8xf32> to vector<10x8xf32>
    %184 = arith.addf %180, %183 : vector<10x8xf32>
    %185 = arith.truncf %184 : vector<10x8xf32> to vector<10x8xbf16>
    %cst_117 = arith.constant dense<0.000000e+00> : vector<10x10xf32>
    %186 = tpu.matmul %169, %177, %cst_117 {dimension_numbers = #tpu.dot_dimension_numbers<[1], [1], [0], [0], [0, 0, 1, 0], [], []>} : vector<10x8xbf16>, vector<10x8xbf16>, vector<10x10xf32> -> vector<10x10xf32>
    %c3_118 = arith.constant 3 : index
    %c0_119 = arith.constant 0 : index
    %c0_120 = arith.constant 0 : index
    %187 = vector.load %arg2[%c3_118, %c0_119, %c0_120] : memref<4x10x10xf32, #tpu.memory_space<vmem>>, vector<1x10x10xf32>
    %188 = vector.shape_cast %187 : vector<1x10x10xf32> to vector<10x10xf32>
    %189 = arith.addf %186, %188 : vector<10x10xf32>
    %cst_121 = arith.constant 0.353553385 : f32
    %190 = vector.broadcast %cst_121 : f32 to vector<10x10xf32>
    %191 = arith.mulf %189, %190 : vector<10x10xf32>
    %cst_122 = arith.constant -1.000000e+30 : f32
    %192 = vector.broadcast %cst_122 : f32 to vector<10x10xf32>
    %193 = arith.select %7, %192, %191 : vector<10x10xi1>, vector<10x10xf32>
    %194 = vector.broadcast %4 : vector<1x10xf32> to vector<10x10xf32>
    %195 = arith.addf %193, %194 : vector<10x10xf32>
    %cst_123 = arith.constant dense<0xFF800000> : vector<10xf32>
    %196 = vector.multi_reduction <maximumf>, %195, %cst_123 [1] : vector<10x10xf32> to vector<10xf32>
    %197 = vector.shape_cast %196 : vector<10xf32> to vector<10x1xf32>
    %198 = vector.broadcast %197 : vector<10x1xf32> to vector<10x10xf32>
    %199 = arith.subf %195, %198 : vector<10x10xf32>
    %200 = math.exp %199 : vector<10x10xf32>
    %cst_124 = arith.constant dense<0.000000e+00> : vector<10xf32>
    %201 = vector.multi_reduction <add>, %200, %cst_124 [1] : vector<10x10xf32> to vector<10xf32>
    %202 = vector.shape_cast %201 : vector<10xf32> to vector<10x1xf32>
    %203 = tpu.reciprocal %202 {approx = true} : vector<10x1xf32> -> vector<10x1xf32>
    %204 = vector.broadcast %203 : vector<10x1xf32> to vector<10x10xf32>
    %205 = arith.mulf %200, %204 : vector<10x10xf32>
    %206 = arith.truncf %205 : vector<10x10xf32> to vector<10x10xbf16>
    %cst_125 = arith.constant dense<0.000000e+00> : vector<10x8xf32>
    %207 = tpu.matmul %206, %185, %cst_125 {dimension_numbers = #tpu.dot_dimension_numbers<[1], [0], [0], [1], [0, 0, 1, 1], [], []>} : vector<10x10xbf16>, vector<10x8xbf16>, vector<10x8xf32> -> vector<10x8xf32>
    %208 = arith.truncf %207 : vector<10x8xf32> to vector<10x8xbf16>
    %c3_126 = arith.constant 3 : index
    %c0_127 = arith.constant 0 : index
    %c0_128 = arith.constant 0 : index
    %209 = vector.load %arg7[%c3_126, %c0_127, %c0_128] : memref<4x8x32xbf16, #tpu.memory_space<vmem>>, vector<1x8x32xbf16>
    %210 = vector.shape_cast %209 : vector<1x8x32xbf16> to vector<8x32xbf16>
    %cst_129 = arith.constant dense<0.000000e+00> : vector<10x32xf32>
    %211 = tpu.matmul %208, %210, %cst_129 {dimension_numbers = #tpu.dot_dimension_numbers<[1], [0], [0], [1], [0, 0, 1, 1], [], []>} : vector<10x8xbf16>, vector<8x32xbf16>, vector<10x32xf32> -> vector<10x32xf32>
    %212 = arith.addf %161, %211 : vector<10x32xf32>
    %c0_130 = arith.constant 0 : index
    %c0_131 = arith.constant 0 : index
    %213 = vector.load %arg8[%c0_130, %c0_131] : memref<1x32xf32, #tpu.memory_space<vmem>>, vector<1x32xf32>
    %214 = vector.broadcast %213 : vector<1x32xf32> to vector<10x32xf32>
    %215 = arith.addf %212, %214 : vector<10x32xf32>
    %216 = arith.addf %215, %1 : vector<10x32xf32>
    %c0_132 = arith.constant 0 : index
    %c0_133 = arith.constant 0 : index
    %217 = vector.load %arg9[%c0_132, %c0_133] : memref<1x32xf32, #tpu.memory_space<vmem>>, vector<1x32xf32>
    %c0_134 = arith.constant 0 : index
    %c0_135 = arith.constant 0 : index
    %218 = vector.load %arg10[%c0_134, %c0_135] : memref<1x32xf32, #tpu.memory_space<vmem>>, vector<1x32xf32>
    %cst_136 = arith.constant dense<0.000000e+00> : vector<10xf32>
    %219 = vector.multi_reduction <add>, %216, %cst_136 [1] : vector<10x32xf32> to vector<10xf32>
    %220 = vector.shape_cast %219 : vector<10xf32> to vector<10x1xf32>
    %cst_137 = arith.constant 3.200000e+01 : f32
    %221 = vector.broadcast %cst_137 : f32 to vector<10x1xf32>
    %222 = arith.divf %220, %221 : vector<10x1xf32>
    %223 = vector.broadcast %222 : vector<10x1xf32> to vector<10x32xf32>
    %224 = arith.subf %216, %223 : vector<10x32xf32>
    %225 = arith.mulf %224, %224 : vector<10x32xf32>
    %cst_138 = arith.constant dense<0.000000e+00> : vector<10xf32>
    %226 = vector.multi_reduction <add>, %225, %cst_138 [1] : vector<10x32xf32> to vector<10xf32>
    %227 = vector.shape_cast %226 : vector<10xf32> to vector<10x1xf32>
    %cst_139 = arith.constant 3.200000e+01 : f32
    %228 = vector.broadcast %cst_139 : f32 to vector<10x1xf32>
    %229 = arith.divf %227, %228 : vector<10x1xf32>
    %cst_140 = arith.constant 9.99999997E-7 : f32
    %230 = vector.broadcast %cst_140 : f32 to vector<10x1xf32>
    %231 = arith.addf %229, %230 : vector<10x1xf32>
    %232 = math.rsqrt %231 : vector<10x1xf32>
    %233 = vector.broadcast %232 : vector<10x1xf32> to vector<10x32xf32>
    %234 = arith.mulf %224, %233 : vector<10x32xf32>
    %235 = vector.broadcast %217 : vector<1x32xf32> to vector<10x32xf32>
    %236 = arith.mulf %234, %235 : vector<10x32xf32>
    %237 = vector.broadcast %218 : vector<1x32xf32> to vector<10x32xf32>
    %238 = arith.addf %236, %237 : vector<10x32xf32>
    %239 = arith.truncf %238 : vector<10x32xf32> to vector<10x32xbf16>
    %c0_141 = arith.constant 0 : index
    %c0_142 = arith.constant 0 : index
    %240 = vector.load %arg11[%c0_141, %c0_142] : memref<32x64xbf16, #tpu.memory_space<vmem>>, vector<32x64xbf16>
    %cst_143 = arith.constant dense<0.000000e+00> : vector<10x64xf32>
    %241 = tpu.matmul %239, %240, %cst_143 {dimension_numbers = #tpu.dot_dimension_numbers<[1], [0], [0], [1], [0, 0, 1, 1], [], []>} : vector<10x32xbf16>, vector<32x64xbf16>, vector<10x64xf32> -> vector<10x64xf32>
    %c0_144 = arith.constant 0 : index
    %c0_145 = arith.constant 0 : index
    %242 = vector.load %arg12[%c0_144, %c0_145] : memref<1x64xf32, #tpu.memory_space<vmem>>, vector<1x64xf32>
    %243 = vector.broadcast %242 : vector<1x64xf32> to vector<10x64xf32>
    %244 = arith.addf %241, %243 : vector<10x64xf32>
    %cst_146 = arith.constant 0.000000e+00 : f32
    %245 = vector.broadcast %cst_146 : f32 to vector<10x64xf32>
    %246 = arith.maximumf %244, %245 : vector<10x64xf32>
    %c0_147 = arith.constant 0 : index
    %c0_148 = arith.constant 0 : index
    %c0_149 = arith.constant 0 : index
    %247 = vector.load %arg4[%c0_147, %c0_148, %c0_149] : memref<1x10x64xf32, #tpu.memory_space<vmem>>, vector<1x10x64xf32>
    %248 = vector.shape_cast %247 : vector<1x10x64xf32> to vector<10x64xf32>
    %249 = arith.addf %246, %248 : vector<10x64xf32>
    %250 = arith.truncf %249 : vector<10x64xf32> to vector<10x64xbf16>
    %c0_150 = arith.constant 0 : index
    %c0_151 = arith.constant 0 : index
    %251 = vector.load %arg13[%c0_150, %c0_151] : memref<64x32xbf16, #tpu.memory_space<vmem>>, vector<64x32xbf16>
    %cst_152 = arith.constant dense<0.000000e+00> : vector<10x32xf32>
    %252 = tpu.matmul %250, %251, %cst_152 {dimension_numbers = #tpu.dot_dimension_numbers<[1], [0], [0], [1], [0, 0, 1, 1], [], []>} : vector<10x64xbf16>, vector<64x32xbf16>, vector<10x32xf32> -> vector<10x32xf32>
    %c0_153 = arith.constant 0 : index
    %c0_154 = arith.constant 0 : index
    %253 = vector.load %arg14[%c0_153, %c0_154] : memref<1x32xf32, #tpu.memory_space<vmem>>, vector<1x32xf32>
    %254 = vector.broadcast %253 : vector<1x32xf32> to vector<10x32xf32>
    %255 = arith.addf %252, %254 : vector<10x32xf32>
    %256 = arith.addf %255, %238 : vector<10x32xf32>
    %c0_155 = arith.constant 0 : index
    %c0_156 = arith.constant 0 : index
    %257 = vector.load %arg15[%c0_155, %c0_156] : memref<1x32xf32, #tpu.memory_space<vmem>>, vector<1x32xf32>
    %c0_157 = arith.constant 0 : index
    %c0_158 = arith.constant 0 : index
    %258 = vector.load %arg16[%c0_157, %c0_158] : memref<1x32xf32, #tpu.memory_space<vmem>>, vector<1x32xf32>
    %cst_159 = arith.constant dense<0.000000e+00> : vector<10xf32>
    %259 = vector.multi_reduction <add>, %256, %cst_159 [1] : vector<10x32xf32> to vector<10xf32>
    %260 = vector.shape_cast %259 : vector<10xf32> to vector<10x1xf32>
    %cst_160 = arith.constant 3.200000e+01 : f32
    %261 = vector.broadcast %cst_160 : f32 to vector<10x1xf32>
    %262 = arith.divf %260, %261 : vector<10x1xf32>
    %263 = vector.broadcast %262 : vector<10x1xf32> to vector<10x32xf32>
    %264 = arith.subf %256, %263 : vector<10x32xf32>
    %265 = arith.mulf %264, %264 : vector<10x32xf32>
    %cst_161 = arith.constant dense<0.000000e+00> : vector<10xf32>
    %266 = vector.multi_reduction <add>, %265, %cst_161 [1] : vector<10x32xf32> to vector<10xf32>
    %267 = vector.shape_cast %266 : vector<10xf32> to vector<10x1xf32>
    %cst_162 = arith.constant 3.200000e+01 : f32
    %268 = vector.broadcast %cst_162 : f32 to vector<10x1xf32>
    %269 = arith.divf %267, %268 : vector<10x1xf32>
    %cst_163 = arith.constant 9.99999997E-7 : f32
    %270 = vector.broadcast %cst_163 : f32 to vector<10x1xf32>
    %271 = arith.addf %269, %270 : vector<10x1xf32>
    %272 = math.rsqrt %271 : vector<10x1xf32>
    %273 = vector.broadcast %272 : vector<10x1xf32> to vector<10x32xf32>
    %274 = arith.mulf %264, %273 : vector<10x32xf32>
    %275 = vector.broadcast %257 : vector<1x32xf32> to vector<10x32xf32>
    %276 = arith.mulf %274, %275 : vector<10x32xf32>
    %277 = vector.broadcast %258 : vector<1x32xf32> to vector<10x32xf32>
    %278 = arith.addf %276, %277 : vector<10x32xf32>
    %c0_164 = arith.constant 0 : index
    %c0_165 = arith.constant 0 : index
    %c0_166 = arith.constant 0 : index
    %279 = vector.load %arg17[%c0_164, %c0_165, %c0_166] : memref<1x10x32xf32, #tpu.memory_space<vmem>>, vector<1x10x32xf32>
    %280 = vector.shape_cast %279 : vector<1x10x32xf32> to vector<10x32xf32>
    %281 = vector.shape_cast %278 : vector<10x32xf32> to vector<1x10x32xf32>
    tpu.vector_store %arg17[%c0_164, %c0_165, %c0_166], %281 {strides = array<i32>} : memref<1x10x32xf32, #tpu.memory_space<vmem>>, vector<1x10x32xf32>,
    return
  }
  func.func @transform_0(%arg0: i32) -> (i32, i32, i32) {
    %c0_i32 = arith.constant 0 : i32
    %c0_i32_0 = arith.constant 0 : i32
    %c0_i32_1 = arith.constant 0 : i32
    return %arg0, %c0_i32, %c0_i32_0 : i32, i32, i32
  }
  func.func @transform_1(%arg0: i32) -> (i32, i32, i32) {
    %c0_i32 = arith.constant 0 : i32
    %c0_i32_0 = arith.constant 0 : i32
    %c0_i32_1 = arith.constant 0 : i32
    return %arg0, %c0_i32, %c0_i32_0 : i32, i32, i32
  }
  func.func @transform_2(%arg0: i32) -> (i32, i32, i32) {
    %c0_i32 = arith.constant 0 : i32
    %c0_i32_0 = arith.constant 0 : i32
    %c0_i32_1 = arith.constant 0 : i32
    return %arg0, %c0_i32, %c0_i32_0 : i32, i32, i32
  }
  func.func @transform_3(%arg0: i32) -> (i32, i32, i32) {
    %c0_i32 = arith.constant 0 : i32
    %c0_i32_0 = arith.constant 0 : i32
    %c0_i32_1 = arith.constant 0 : i32
    return %arg0, %c0_i32, %c0_i32_0 : i32, i32, i32
  }
  func.func @transform_4(%arg0: i32) -> (i32, i32, i32) {
    %c0_i32 = arith.constant 0 : i32
    %c0_i32_0 = arith.constant 0 : i32
    %c0_i32_1 = arith.constant 0 : i32
    %c0_i32_2 = arith.constant 0 : i32
    return %c0_i32, %c0_i32_0, %c0_i32_1 : i32, i32, i32
  }
  func.func @transform_5(%arg0: i32) -> (i32, i32, i32) {
    %c0_i32 = arith.constant 0 : i32
    %c0_i32_0 = arith.constant 0 : i32
    %c0_i32_1 = arith.constant 0 : i32
    %c0_i32_2 = arith.constant 0 : i32
    return %c0_i32, %c0_i32_0, %c0_i32_1 : i32, i32, i32
  }
  func.func @transform_6(%arg0: i32) -> (i32, i32, i32) {
    %c0_i32 = arith.constant 0 : i32
    %c0_i32_0 = arith.constant 0 : i32
    %c0_i32_1 = arith.constant 0 : i32
    %c0_i32_2 = arith.constant 0 : i32
    return %c0_i32, %c0_i32_0, %c0_i32_1 : i32, i32, i32
  }
  func.func @transform_7(%arg0: i32) -> (i32, i32) {
    %c0_i32 = arith.constant 0 : i32
    %c0_i32_0 = arith.constant 0 : i32
    %c0_i32_1 = arith.constant 0 : i32
    return %c0_i32, %c0_i32_0 : i32, i32
  }
  func.func @transform_8(%arg0: i32) -> (i32, i32) {
    %c0_i32 = arith.constant 0 : i32
    %c0_i32_0 = arith.constant 0 : i32
    %c0_i32_1 = arith.constant 0 : i32
    return %c0_i32, %c0_i32_0 : i32, i32
  }
  func.func @transform_9(%arg0: i32) -> (i32, i32) {
    %c0_i32 = arith.constant 0 : i32
    %c0_i32_0 = arith.constant 0 : i32
    %c0_i32_1 = arith.constant 0 : i32
    return %c0_i32, %c0_i32_0 : i32, i32
  }
  func.func @transform_10(%arg0: i32) -> (i32, i32) {
    %c0_i32 = arith.constant 0 : i32
    %c0_i32_0 = arith.constant 0 : i32
    %c0_i32_1 = arith.constant 0 : i32
    return %c0_i32, %c0_i32_0 : i32, i32
  }
  func.func @transform_11(%arg0: i32) -> (i32, i32) {
    %c0_i32 = arith.constant 0 : i32
    %c0_i32_0 = arith.constant 0 : i32
    %c0_i32_1 = arith.constant 0 : i32
    return %c0_i32, %c0_i32_0 : i32, i32
  }
  func.func @transform_12(%arg0: i32) -> (i32, i32) {
    %c0_i32 = arith.constant 0 : i32
    %c0_i32_0 = arith.constant 0 : i32
    %c0_i32_1 = arith.constant 0 : i32
    return %c0_i32, %c0_i32_0 : i32, i32
  }
  func.func @transform_13(%arg0: i32) -> (i32, i32) {
    %c0_i32 = arith.constant 0 : i32
    %c0_i32_0 = arith.constant 0 : i32
    %c0_i32_1 = arith.constant 0 : i32
    return %c0_i32, %c0_i32_0 : i32, i32
  }
  func.func @transform_14(%arg0: i32) -> (i32, i32) {
    %c0_i32 = arith.constant 0 : i32
    %c0_i32_0 = arith.constant 0 : i32
    %c0_i32_1 = arith.constant 0 : i32
    return %c0_i32, %c0_i32_0 : i32, i32
  }
  func.func @transform_15(%arg0: i32) -> (i32, i32) {
    %c0_i32 = arith.constant 0 : i32
    %c0_i32_0 = arith.constant 0 : i32
    %c0_i32_1 = arith.constant 0 : i32
    return %c0_i32, %c0_i32_0 : i32, i32
  }
  func.func @transform_16(%arg0: i32) -> (i32, i32, i32) {
    %c0_i32 = arith.constant 0 : i32
    %c0_i32_0 = arith.constant 0 : i32
    %c0_i32_1 = arith.constant 0 : i32
    return %arg0, %c0_i32, %c0_i32_0 : i32, i32, i32
  }
}

module attributes {stable_mosaic.version = 11 : i64} {
  func.func @_matmul_bias_kernel(%arg0: i32, %arg1: i32, %arg2: i32, %arg3: memref<24x128xbf16, #tpu.memory_space<vmem>>, %arg4: memref<128x128xbf16, #tpu.memory_space<vmem>>, %arg5: memref<1x128xf32, #tpu.memory_space<vmem>>, %arg6: memref<24x128xf32, #tpu.memory_space<vmem>>, %arg7: memref<24x128xf32, #tpu.memory_space<vmem>>) attributes {dimension_semantics = [#tpu.dimension_semantics<parallel>, #tpu.dimension_semantics<parallel>, #tpu.dimension_semantics<arbitrary>], iteration_bounds = array<i64: 1, 1, 1>, scalar_prefetch = 0 : i64, scratch_operands = 1 : i64, tpu.core_type = #tpu.core_type<tc>, window_params = [{transform_indices = @transform_0, window_bounds = array<i64: 24, 128>}, {transform_indices = @transform_1, window_bounds = array<i64: 128, 128>}, {transform_indices = @transform_2, window_bounds = array<i64: 1, 128>}, {transform_indices = @transform_3, window_bounds = array<i64: 24, 128>}]} {
    %c0_i32 = arith.constant 0 : i32
    %0 = arith.cmpi eq, %arg2, %c0_i32 : i32
    %1 = arith.extui %0 : i1 to i32
    %c0_i32_0 = arith.constant 0 : i32
    %2 = arith.cmpi ne, %1, %c0_i32_0 : i32
    scf.if %2 {
      %cst_10 = arith.constant 0.000000e+00 : f32
      %12 = vector.broadcast %cst_10 : f32 to vector<24x128xf32>
      %c0_11 = arith.constant 0 : index
      %c0_12 = arith.constant 0 : index
      %13 = vector.load %arg7[%c0_11, %c0_12] : memref<24x128xf32, #tpu.memory_space<vmem>>, vector<24x128xf32>
      tpu.vector_store %arg7[%c0_11, %c0_12], %12 {strides = array<i32>} : memref<24x128xf32, #tpu.memory_space<vmem>>, vector<24x128xf32>,
    } else {
    }
    %c0 = arith.constant 0 : index
    %c0_1 = arith.constant 0 : index
    %3 = vector.load %arg7[%c0, %c0_1] : memref<24x128xf32, #tpu.memory_space<vmem>>, vector<24x128xf32>
    %c0_2 = arith.constant 0 : index
    %c0_3 = arith.constant 0 : index
    %4 = vector.load %arg3[%c0_2, %c0_3] : memref<24x128xbf16, #tpu.memory_space<vmem>>, vector<24x128xbf16>
    %c0_4 = arith.constant 0 : index
    %c0_5 = arith.constant 0 : index
    %5 = vector.load %arg4[%c0_4, %c0_5] : memref<128x128xbf16, #tpu.memory_space<vmem>>, vector<128x128xbf16>
    %cst = arith.constant dense<0.000000e+00> : vector<24x128xf32>
    %6 = tpu.matmul %4, %5, %cst {dimension_numbers = #tpu.dot_dimension_numbers<[1], [0], [0], [1], [0, 0, 1, 1], [], []>} : vector<24x128xbf16>, vector<128x128xbf16>, vector<24x128xf32> -> vector<24x128xf32>
    %7 = arith.addf %3, %6 : vector<24x128xf32>
    %c0_6 = arith.constant 0 : index
    %c0_7 = arith.constant 0 : index
    %8 = vector.load %arg7[%c0_6, %c0_7] : memref<24x128xf32, #tpu.memory_space<vmem>>, vector<24x128xf32>
    tpu.vector_store %arg7[%c0_6, %c0_7], %7 {strides = array<i32>} : memref<24x128xf32, #tpu.memory_space<vmem>>, vector<24x128xf32>,
    %c0_i32_8 = arith.constant 0 : i32
    %9 = arith.cmpi eq, %arg2, %c0_i32_8 : i32
    %10 = arith.extui %9 : i1 to i32
    %c0_i32_9 = arith.constant 0 : i32
    %11 = arith.cmpi ne, %10, %c0_i32_9 : i32
    scf.if %11 {
      %c0_10 = arith.constant 0 : index
      %c0_11 = arith.constant 0 : index
      %12 = vector.load %arg7[%c0_10, %c0_11] : memref<24x128xf32, #tpu.memory_space<vmem>>, vector<24x128xf32>
      %c0_12 = arith.constant 0 : index
      %c0_13 = arith.constant 0 : index
      %13 = vector.load %arg5[%c0_12, %c0_13] : memref<1x128xf32, #tpu.memory_space<vmem>>, vector<1x128xf32>
      %14 = vector.broadcast %13 : vector<1x128xf32> to vector<24x128xf32>
      %15 = arith.addf %12, %14 : vector<24x128xf32>
      %c0_14 = arith.constant 0 : index
      %c0_15 = arith.constant 0 : index
      %16 = vector.load %arg6[%c0_14, %c0_15] : memref<24x128xf32, #tpu.memory_space<vmem>>, vector<24x128xf32>
      tpu.vector_store %arg6[%c0_14, %c0_15], %15 {strides = array<i32>} : memref<24x128xf32, #tpu.memory_space<vmem>>, vector<24x128xf32>,
    } else {
    }
    return
  }
  func.func @transform_0(%arg0: i32, %arg1: i32, %arg2: i32) -> (i32, i32) {
    %c0_i32 = arith.constant 0 : i32
    return %arg0, %arg2 : i32, i32
  }
  func.func @transform_1(%arg0: i32, %arg1: i32, %arg2: i32) -> (i32, i32) {
    %c0_i32 = arith.constant 0 : i32
    return %arg2, %arg1 : i32, i32
  }
  func.func @transform_2(%arg0: i32, %arg1: i32, %arg2: i32) -> (i32, i32) {
    %c0_i32 = arith.constant 0 : i32
    %c0_i32_0 = arith.constant 0 : i32
    return %c0_i32, %arg1 : i32, i32
  }
  func.func @transform_3(%arg0: i32, %arg1: i32, %arg2: i32) -> (i32, i32) {
    %c0_i32 = arith.constant 0 : i32
    return %arg0, %arg1 : i32, i32
  }
}

</mosaic_0001>

<bundles_post_ra>
// kernel: music_transformer_forward.5
= control target key start
LH: loop header
LB: loop body
LE: loop exit
PB: predicated region body
PF: predicated region fallthrough
CT: control target
= control target key end

     0   :  { %s292_s1 = inlined_call_operand.vmem [shape: bf16[128,128], index: 1, kind: input, shape index: {}]   ;;  %s293_s0 = inlined_call_operand.vmem [shape: bf16[24,128], index: 0, kind: input, shape index: {}]   ;;  %s294_s2 = inlined_call_operand.vmem [shape: f32[1,128], index: 2, kind: input, shape index: {}]   ;;  %s295_s3 = inlined_call_operand.vmem [shape: f32[24,128], index: 3, kind: output, shape index: {}]  }
   0x1   :  { %v220_v0 = vld [vmem:[%s292_s1 + $0x38] sm:$0xff]   ;;  %v221_v1 = vld [vmem:[%s292_s1 + $0x30] sm:$0xff]   ;;  %v222_v2 = vld [vmem:[%s292_s1 + $0x28] sm:$0xff]  }
   0x2   :  { %200 = vmatprep.subr.bf16.mxu0 %v220_v0  ;;  %v223_v3 = vld [vmem:[%s292_s1 + $0x20] sm:$0xff]   ;;  %v224_v5 = vld [vmem:[%s292_s1 + $0x18] sm:$0xff]   ;;  %v225_v6 = vld [vmem:[%s292_s1 + $0x10] sm:$0xff]  }
   0x3   :  { %201 = vmatpush3.bf16.msra.mxu0 %v220_v0  ;;  %v228_v4 = vld [vmem:[%s293_s0] sm:$0xff]   ;;  %v226_v7 = vld [vmem:[%s292_s1 + $0x8] sm:$0xff]  }
   0x4   :  { %202 = vmatprep.subr.bf16.mxu0 %v221_v1  ;;  %216 = vmatprep.mubr.bf16.mxu0 %v228_v4  ;;  %v227_v8 = vld [vmem:[%s292_s1] sm:$0xff]   ;;  %v229_v9 = vld [vmem:[%s293_s0 + $0x8] ss:$0 sps:$4 sm:$0xff]  }
   0x5   :  { %v189_v10 = vld [vmem:[%s294_s2] ss:$0 sm:$0xff] }
   0x7   :  { %203 = vmatpush3.bf16.msra.mxu0 %v221_v1 }
   0x8   :  { %204 = vmatprep.subr.bf16.mxu0 %v222_v2 }
   0xb   :  { %205 = vmatpush3.bf16.msra.mxu0 %v222_v2 }
   0xc   :  { %206 = vmatprep.subr.bf16.mxu0 %v223_v3 }
   0xf   :  { %207 = vmatpush3.bf16.msra.mxu0 %v223_v3 }
  0x10   :  { %208 = vmatprep.subr.bf16.mxu0 %v224_v5 }
  0x13   :  { %209 = vmatpush3.bf16.msra.mxu0 %v224_v5 }
  0x14   :  { %210 = vmatprep.subr.bf16.mxu0 %v225_v6 }
  0x17   :  { %211 = vmatpush3.bf16.msra.mxu0 %v225_v6 }
  0x18   :  { %212 = vmatprep.subr.bf16.mxu0 %v226_v7 }
  0x1b   :  { %213 = vmatpush3.bf16.msra.mxu0 %v226_v7 }
  0x1c   :  { %214 = vmatprep.subr.bf16.mxu0 %v227_v8 }
  0x1f   :  { %215 = vmatpush3.bf16.msra.mxu0 %v227_v8 }
  0x22   :  { %217 = vmatmul.mubr.bf16.vlgmr.msra.gmra.mxu0 %v229_v9 }
  0xe2   :  { %v218_v11 = vpop.f32.mrf.mxu0 }
  0xe3   :  { %v171_v12 = vadd.f32 %v218_v11, %v189_v10 }
  0xe4   :  { %v136_v13 = vpop.f32.mrf.mxu0 }
  0xe5   :  { %174 = vst [vmem:[%s295_s3 + $0x10] sm:$0xff] %v171_v12  ;;  %v169_v14 = vadd.f32 %v189_v10, %v136_v13 }
  0xe6   :  { %v219_v15 = vpop.f32.mrf.mxu0 }
  0xe7   :  { %172 = vst [vmem:[%s295_s3] sm:$0xff] %v169_v14 }
  0xe8   :  { %v139_v16 = vpop.f32.mrf.mxu0 }
  0xe9   :  { %v170_v17 = vadd.f32 %v189_v10, %v139_v16 }
  0xeb   :  { %173 = vst [vmem:[%s295_s3 + $0x8] sm:$0xff] %v170_v17 }

// kernel: music_transformer_forward.3
= control target key start
LH: loop header
LB: loop body
LE: loop exit
PB: predicated region body
PF: predicated region fallthrough
CT: control target
= control target key end

     0   :  { %s3061_s21 = smov 0   ;;  %s3519_s0 = inlined_call_operand.vmem [shape: f32[2,10,32], index: 0, kind: input, shape index: {}]   ;;  %s3520_s1 = inlined_call_operand.vmem [shape: f32[8,10,10], index: 1, kind: input, shape index: {}]   ;;  %s3521_s2 = inlined_call_operand.vmem [shape: f32[2,1,10], index: 2, kind: input, shape index: {}]   ;;  %s3522_s3 = inlined_call_operand.vmem [shape: f32[2,10,64], index: 3, kind: input, shape index: {}]   ;;  %s3523_s4 = inlined_call_operand.vmem [shape: bf16[12,32,8], index: 4, kind: input, shape index: {}]   ;;  %s3524_s5 = inlined_call_operand.vmem [shape: f32[12,1,8], index: 5, kind: input, shape index: {}]   ;;  %s3525_s6 = inlined_call_operand.vmem [shape: bf16[4,8,32], index: 6, kind: input, shape index: {}]   ;;  %s3526_s7 = inlined_call_operand.vmem [shape: f32[1,32], index: 7, kind: input, shape index: {}]   ;;  %s3527_s8 = inlined_call_operand.vmem [shape: f32[1,32], index: 8, kind: input, shape index: {}]   ;;  %s3528_s9 = inlined_call_operand.vmem [shape: f32[1,32], index: 9, kind: input, shape index: {}]   ;;  %s3529_s10 = inlined_call_operand.vmem [shape: bf16[32,64], index: 10, kind: input, shape index: {}]   ;;  %s3530_s11 = inlined_call_operand.vmem [shape: f32[1,64], index: 11, kind: input, shape index: {}]   ;;  %s3531_s12 = inlined_call_operand.vmem [shape: bf16[64,32], index: 12, kind: input, shape index: {}]   ;;  %s3532_s13 = inlined_call_operand.vmem [shape: f32[1,32], index: 13, kind: input, shape index: {}]   ;;  %s3533_s14 = inlined_call_operand.vmem [shape: f32[1,32], index: 14, kind: input, shape index: {}]   ;;  %s3534_s15 = inlined_call_operand.vmem [shape: f32[1,32], index: 15, kind: input, shape index: {}]   ;;  %s3535_s16 = inlined_call_operand.vmem [shape: f32[2,10,32], index: 16, kind: output, shape index: {}]  }
   0x1   :  { %3536 = sst [smem:[#allocation2_spill]] %s3519_s0 }
   0x2 LB: > { %s3067_s22 = sadd.s32 4294967295, %s2972_s21   ;;  %p2472_p0 = scmp.ge.s32.totalorder %s2972_s21, 1  ;;  %s2972_s21 = sphi %s3061_s21, %s26_s21  }
   0x3   : > { %p492_p1 = scmp.lt.s32.totalorder %s2972_s21, 3 }
   0x5   : > { %p493_p2 = pnand %p2472_p0, %p492_p1 }
   0x6   : > { %p556_p3 = scmp.lt.s32.totalorder (!%p493_p2), %s3067_s22, 1  ;;  %s3537_s20 = sld [smem:[#allocation2_spill]] (!%p493_p2) }
   0x7   : > { %496 = sbr.rel (%p493_p2) target bundleno = 4770 (0x12a2), region = 84  ;;  %s2475_s19 = sshll.u32 (!%p493_p2), %s3067_s22, 2 }
   0x8   : > { %p562_p4 = scmp.lt.s32.totalorder (!%p493_p2), %s2475_s19, 7 }
   0xc   : > { %v2894_v0 = vld [vmem:[%s3523_s4 + $0x48] sm:$0xff]   ;;  %v2974_v1 = vmov 0.0   ;;  %v2896_v3 = vld [vmem:[%s3523_s4 + $0x40] sm:$0xff]   ;;  %vm2975_vm0 = vmmov 0   ;;  %s3091_s0 = scalar_select %p556_p3, %s3067_s22, 1  ;;  %vm616_vm1 = vcmask 261120   ;;  %v586_v27 = vlaneseq }
   0xd   : > { %2704 = vmatprep.subr.bf16.mxu1 %v2974_v1  ;;  %2696 = vmatprep.subr.bf16.mxu0 %v2974_v1  ;;  %v2895_v2 = vld [vmem:[%s3523_s4 + $0x8] sm:$0xff]   ;;  %v2897_v4 = vld [vmem:[%s3523_s4] sm:$0xff]   ;;  %vm798_vm2 = vcmask 64512   ;;  %s3539_s19 = smov (!%p562_p4, %s2475_s19), 7  ;;  %vm858_vm4 = vcmask 80896   ;;  %vm862_vm6 = vcmask 74752  }
   0xe   : > { %2705 = vmatpush3.bf16.msra.mxu1 %v2894_v0  ;;  %2708 = vmatprep.mubr.msk.bf16.mxu1 %vm2975_vm0, %v2974_v1  ;;  %s3096_s17 = sshll.u32 %s3091_s0, 4  ;;  %v2491_v10 = vld [vmem:[%s3524_s5 + $0x4] ss:$0 sm:$0xff]  ;;  %v2482_v20 = vld [vmem:[%s3524_s5] ss:$0 sm:$0xff]  ;;  %v2898_v25 = vld [vmem:[%s3523_s4 + $0x88] sm:$0xff]   ;;  %s570_s22 = scalar_lea.vmem %s3521_s2, %s3091_s0 }
   0xf   : > { %2697 = vmatpush3.bf16.msra.mxu0 %v2895_v2  ;;  %2706 = vmatprep.subr.bf16.mxu1 %v2974_v1  ;;  %s3102_s23 = scalar_lea.vmem %s3537_s20, %s3096_s17  ;;  %v2899_v26 = vld [vmem:[%s3523_s4 + $0x80] sm:$0xff]   ;;  %s2625_s20 = sshll.u32 %s3539_s19, 4  ;;  %v3148_v29 = vshrl.u32 %v586_v27, 7  ;;  %v3150_v30 = vand.u32 127, %v586_v27  ;;  %v2500_v58 = vld [vmem:[%s3524_s5 + $0x8] ss:$0 sm:$0xff] }
  0x10   : > { %2698 = vmatprep.subr.bf16.mxu0 %v2974_v1  ;;  %2700 = vmatprep.mubr.msk.bf16.mxu0 %vm2975_vm0, %v2974_v1  ;;  %v582_v5 = vld [vmem:[%s3102_s23] sm:$0xff]  ;;  %v583_v6 = vld [vmem:[%s3102_s23 + $0x8] sm:$0x3]  ;;  %s3145_s26 = scalar_lea.vmem %s3520_s1, %s2625_s20  ;;  %vm886_vm7 = vcmask 1044480   ;;  %vm1266_vm8 = vcmask 1043456   ;;  %vm2132_vm9 = vcmask 254976   ;;  %s580_s29 = scalar_lea.vmem %s3535_s16, %s3096_s17 }
  0x11   : > { %v3108_v7 = vpack.c.bf16 %v583_v6, %v582_v5  ;;  %v796_v28 = vld [vmem:[%s3145_s26] sm:$0xff]  ;;  %v3157_v34 = vadd.s32 8, %v3148_v29  ;;  %v797_v35 = vld [vmem:[%s3145_s26 + $0x8] sm:$0x3]  ;;  %vm591_vm3 = vcmp.gt.s32.totalorder %v3150_v30, %v3148_v29  ;;  %v2903_v5 = vld [vmem:[%s3523_s4 + $0x10] sm:$0xff]   ;;  %vm2287_vm10 = vcmask 523264  }
  0x12   : > { %2707 = vmatpush3.bf16.msra.mxu1 %v2896_v3  ;;  %v3162_v37 = vld [vmem:[%s570_s22] ss:$0 sm:$0xff] }
  0x13   : > { %2699 = vmatpush3.bf16.msra.mxu0 %v2897_v4  ;;  %2720 = vmatprep.subr.bf16.mxu1 %v2974_v1  ;;  %vm592_vm5 = vcmp.gt.s32.totalorder %v3150_v30, %v3157_v34  ;;  %v2901_v4 = vld [vmem:[%s3523_s4 + $0x18] sm:$0xff]  }
  0x14   : > { %2712 = vmatprep.subr.bf16.mxu0 %v2974_v1 }
  0x15   : > { %2709 = vmatmul.mubr.msk.bf16.vlgmr.msra.gmra.mxu1 %vm616_vm1, %v3108_v7 }
  0x16   : > { %2701 = vmatmul.mubr.msk.bf16.vlgmr.msra.gmra.mxu0 %vm616_vm1, %v3108_v7  ;;  %2722 = vmatprep.mubr.msk.bf16.mxu1 %vm2975_vm0, %v2974_v1 }
  0x17   : > { %2716 = vmatprep.mubr.msk.bf16.mxu0 %vm2975_vm0, %v2974_v1  ;;  %2713 = vmatpush3.bf16.msra.mxu0 %v2898_v25 }
  0x18   : > { %2714 = vmatprep.subr.bf16.mxu0 %v2974_v1 }
  0x1b   : > { %2715 = vmatpush3.bf16.msra.mxu0 %v2899_v26 }
  0x1c   : > { %2726 = vmatprep.subr.bf16.mxu0 %v2974_v1 }
  0x1e   : > { %2717 = vmatmul.mubr.msk.bf16.vlgmr.msra.gmra.mxu0 %vm616_vm1, %v3108_v7 }
  0x1f   : > { %2728 = vmatprep.mubr.msk.bf16.mxu0 %vm2975_vm0, %v2974_v1 }
  0xd5   : > { %v721_v8 = vpop.f32.mrf.mxu1 }
  0xd6   : > { %v654_v9 = vpop.f32.mrf.mxu0  ;;  %v722_v15 = vadd.f32 %v2491_v10, %v721_v8 }
  0xd7   : > { %v2710_v11 = vpop.f32.mrf.mxu1  ;;  %v655_v22 = vadd.f32 %v2482_v20, %v654_v9 }
  0xd8   : > { %v2702_v12 = vpop.f32.mrf.mxu0 }
  0xd9   : > { %v724_v13 = vpop.f32.mrf.mxu1 }
  0xda   : > { %v657_v14 = vpop.f32.mrf.mxu0  ;;  %v725_v16 = vadd.f32 %v2491_v10, %v724_v13  ;;  %v2900_v13 = vld [vmem:[%s3523_s4 + $0x58] sm:$0xff]  }
  0xdb   : > { %v2711_v17 = vpop.f32.mrf.mxu1  ;;  %v658_v23 = vadd.f32 %v2482_v20, %v657_v14 }
  0xdc   : > { %v2703_v18 = vpop.f32.mrf.mxu0  ;;  %v728_v19 = vpack.c.bf16 %v725_v16, %v722_v15  ;;  %v2902_v15 = vld [vmem:[%s3523_s4 + $0x50] sm:$0xff]   ;;  %v2512_v16 = vld [vmem:[%s3524_s5 + $0x1] ss:$0 sm:$0xff] }
  0xdd   : > { %v661_v24 = vpack.c.bf16 %v658_v23, %v655_v22 }
  0xde   : > { %v803_v21 = vsel %vm798_vm2, %v728_v19, 0  ;;  %v788_v59 = vpop.f32.mrf.mxu0 }
  0xdf   : > { %2721 = vmatpush3.bf16.xpose.msra.mxu1 %v803_v21  ;;  %v789_v61 = vadd.f32 %v2500_v58, %v788_v59 }
  0xe0   : > { %2732 = vmatprep.subr.bf16.mxu1 %v2974_v1  ;;  %v2718_v60 = vpop.f32.mrf.mxu0 }
  0xe2   : > { %v791_v62 = vpop.f32.mrf.mxu0 }
  0xe3   : > { %v792_v63 = vadd.f32 %v2500_v58, %v791_v62 }
  0xe4   : > { %v2719_v0 = vpop.f32.mrf.mxu0 }
  0xe5   : > { %v795_v2 = vpack.c.bf16 %v792_v63, %v789_v61 }
  0xe6   : > { %2723 = vmatmul.mubr.msk.bf16.vlgmr.msra.gmra.mxu1 %vm798_vm2, %v661_v24 }
  0xe7   : > { %2736 = vmatprep.mubr.msk.bf16.mxu1 %vm2975_vm0, %v2974_v1  ;;  %v888_v3 = vsel %vm886_vm7, %v795_v2, 0  ;;  %2733 = vmatpush3.bf16.msra.mxu1 %v2901_v4 }
  0xe8   : > { %2727 = vmatpush3.bf16.msra.mxu0 %v888_v3  ;;  %2734 = vmatprep.subr.bf16.mxu1 %v2974_v1 }
  0xe9   : > { %2740 = vmatprep.subr.bf16.mxu0 %v2974_v1 }
  0xeb   : > { %2735 = vmatpush3.bf16.msra.mxu1 %v2903_v5 }
  0xec   : > { %2748 = vmatprep.subr.bf16.mxu1 %v2974_v1 }
  0xee   : > { %2737 = vmatmul.mubr.msk.bf16.vlgmr.msra.gmra.mxu1 %vm616_vm1, %v3108_v7 }
  0xef   : > { %2752 = vmatprep.mubr.msk.bf16.mxu1 %vm2975_vm0, %v2974_v1 }
 0x1a6   : > { %v839_v31 = vpop.f32.mrf.mxu1 }
 0x1a7   : > { %v840_v32 = vadd.f32 %v839_v31, %v796_v28 }
 0x1a8   : > { %v2724_v33 = vpop.f32.mrf.mxu1 }
 0x1a9   : > { %v846_v36 = vmul.f32 0.35355338, %v840_v32  ;;  %v2521_v32 = vld [vmem:[%s3524_s5 + $0x5] ss:$0 sm:$0xff] }
 0x1aa   : > { %v842_v38 = vpop.f32.mrf.mxu1 }
 0x1ab   : > { %v843_v39 = vadd.f32 %v842_v38, %v797_v35  ;;  %v848_v40 = vsel %vm591_vm3, -1e+30, %v846_v36 }
 0x1ac   : > { %v2725_v41 = vpop.f32.mrf.mxu1  ;;  %v856_v42 = vadd.f32 %v3162_v37, %v848_v40 }
 0x1ad   : > { %v847_v43 = vmul.f32 0.35355338, %v843_v39 }
 0x1ae   : > { %v859_v44 = vsel %vm858_vm4, %v856_v42, -inf  ;;  %v992_v17 = vpop.f32.mrf.mxu1 }
 0x1af   : > { %v849_v45 = vsel %vm592_vm5, -1e+30, %v847_v43  ;;  %860 = vmax.xlane.f32.xlu0 %v859_v44  ;;  %v993_v19 = vadd.f32 %v2512_v16, %v992_v17  ;;  %v2905_v43 = vld [vmem:[%s3523_s4 + $0x90] sm:$0xff]  }
 0x1b0   : > { %v857_v46 = vadd.f32 %v3162_v37, %v849_v45  ;;  %v2738_v18 = vpop.f32.mrf.mxu1  ;;  %v2534_v44 = vld [vmem:[%s3145_s26 + $0x10] sm:$0xff] }
 0x1b2   : > { %v863_v47 = vsel %vm862_vm6, %v857_v46, -inf  ;;  %v995_v20 = vpop.f32.mrf.mxu1 }
 0x1b3   : > { %864 = vmax.xlane.f32.xlu0 %v863_v47  ;;  %v996_v21 = vadd.f32 %v2512_v16, %v995_v20 }
 0x1b4   : > { %v2739_v22 = vpop.f32.mrf.mxu1 }
 0x1b5   : > { %v999_v23 = vpack.c.bf16 %v996_v21, %v993_v19  ;;  %v932_v21 = vld [vmem:[%s3525_s6] sm:$0xf] }
 0x238   : > { %v861_v48 = vpop.xlane.xlu0 %860 }
 0x239   : > { %v866_v49 = vsub.f32 %v856_v42, %v861_v48  ;;  %v2904_v42 = vld [vmem:[%s3523_s4 + $0x98] sm:$0xff]  }
 0x23a   : > { %2749 = vmatpush3.bf16.msra.mxu1 %v2904_v42  ;;  %v2535_v48 = vld [vmem:[%s3145_s26 + $0x18] sm:$0x3] }
 0x23b   : > { %v868_v50 = vmul.f32 1.442695, %v866_v49  ;;  %2750 = vmatprep.subr.bf16.mxu1 %v2974_v1 }
 0x23c   : > { %v865_v51 = vpop.xlane.xlu0 %864 }
 0x23d   : > { %2924 = vpow2.f32 %v868_v50  ;;  %v867_v52 = vsub.f32 %v857_v46, %v865_v51 }
 0x23e   : > { %2751 = vmatpush3.bf16.msra.mxu1 %v2905_v43 }
 0x23f   : > { %v870_v53 = vmul.f32 1.442695, %v867_v52  ;;  %2762 = vmatprep.subr.bf16.mxu1 %v2974_v1 }
 0x241   : > { %2926 = vpow2.f32 %v870_v53  ;;  %2753 = vmatmul.mubr.msk.bf16.vlgmr.msra.gmra.mxu1 %vm616_vm1, %v3108_v7 }
 0x242   : > { %2764 = vmatprep.mubr.msk.bf16.mxu1 %vm2975_vm0, %v2974_v1 }
 0x24a   : > { %v2925_v54 = vpop.eup %2924 }
 0x24b   : > { %v872_v55 = vsel %vm858_vm4, %v2925_v54, 0.0 }
 0x24c   : > { %873 = vadd.xlane.f32.xlu1 %v872_v55 }
 0x24e   : > { %v2927_v56 = vpop.eup %2926 }
 0x24f   : > { %v875_v57 = vsel %vm862_vm6, %v2927_v56, 0.0 }
 0x250   : > { %876 = vadd.xlane.f32.xlu1 %v875_v57 }
 0x2d5   : > { %v874_v6 = vpop.xlane.xlu1 %873 }
 0x2d6   : > { %2928 = vrcp.f32 %v874_v6 }
 0x2d9   : > { %v877_v8 = vpop.xlane.xlu1 %876 }
 0x2da   : > { %2930 = vrcp.f32 %v877_v8 }
 0x2e3   : > { %v2929_v9 = vpop.eup %2928 }
 0x2e4   : > { %v880_v11 = vmul.f32 %v2929_v9, %v2925_v54 }
 0x2e7   : > { %v2931_v10 = vpop.eup %2930 }
 0x2e8   : > { %v881_v12 = vmul.f32 %v2931_v10, %v2927_v56  ;;  %v2530_v10 = vld [vmem:[%s3524_s5 + $0x9] ss:$0 sm:$0xff] }
 0x2ea   : > { %v882_v14 = vpack.c.bf16 %v881_v12, %v880_v11 }
 0x2ec   : > { %2729 = vmatmul.mubr.msk.bf16.vlgmr.msra.gmra.mxu0 %vm858_vm4, %v882_v14 }
 0x2ed   : > { %2741 = vmatpush3.bf16.msra.mxu0 %v2900_v13  ;;  %2744 = vmatprep.mubr.msk.bf16.mxu0 %vm2975_vm0, %v2974_v1 }
 0x2ee   : > { %2742 = vmatprep.subr.bf16.mxu0 %v2974_v1 }
 0x2f1   : > { %2743 = vmatpush3.bf16.msra.mxu0 %v2902_v15 }
 0x2f2   : > { %2756 = vmatprep.subr.bf16.mxu0 %v2974_v1 }
 0x2f4   : > { %2745 = vmatmul.mubr.msk.bf16.vlgmr.msra.gmra.mxu0 %vm616_vm1, %v3108_v7 }
 0x2f5   : > { %2758 = vmatprep.mubr.msk.bf16.mxu0 %vm2975_vm0, %v2974_v1 }
 0x301   : > { %v1126_v60 = vpop.f32.mrf.mxu1 }
 0x302   : > { %v1127_v11 = vadd.f32 %v2530_v10, %v1126_v60 }
 0x303   : > { %v2754_v61 = vpop.f32.mrf.mxu1 }
 0x305   : > { %v1129_v12 = vpop.f32.mrf.mxu1 }
 0x306   : > { %v1130_v13 = vadd.f32 %v2530_v10, %v1129_v12  ;;  %v2569_v10 = vld [vmem:[%s3145_s26 + $0x28] sm:$0x3] }
 0x307   : > { %v2755_v14 = vpop.f32.mrf.mxu1 }
 0x308   : > { %v1133_v15 = vpack.c.bf16 %v1130_v13, %v1127_v11 }
 0x30a   : > { %v1217_v16 = vsel %vm886_vm7, %v1133_v15, 0 }
 0x30b   : > { %2763 = vmatpush3.bf16.msra.mxu1 %v1217_v16 }
 0x30c   : > { %2774 = vmatprep.subr.bf16.mxu1 %v2974_v1 }
 0x3ac   : > { %v3213_v24 = vpop.f32.mrf.mxu0 }
 0x3ae   : > { %v2730_v25 = vpop.f32.mrf.mxu0 }
 0x3b0   : > { %v3215_v26 = vpop.f32.mrf.mxu0 }
 0x3b1   : > { %v931_v27 = vpack.c.bf16 %v3215_v26, %v3213_v24  ;;  %v2538_v24 = vld [vmem:[%s3525_s6 + $0x4] sm:$0xf] }
 0x3b2   : > { %v2731_v28 = vpop.f32.mrf.mxu0  ;;  %v1268_v26 = vsel %vm1266_vm8, %v2538_v24, 0 }
 0x3b3   : > { %v1315_v28 = vsel %vm1266_vm8, %v932_v21, 0 }
 0x3b4   : > { %v1059_v31 = vpop.f32.mrf.mxu0 }
 0x3b5   : > { %v1060_v36 = vadd.f32 %v2521_v32, %v1059_v31  ;;  %v2906_v31 = vld [vmem:[%s3523_s4 + $0x68] sm:$0xff]  }
 0x3b6   : > { %v2746_v33 = vpop.f32.mrf.mxu0 }
 0x3b8   : > { %v1062_v35 = vpop.f32.mrf.mxu0 }
 0x3b9   : > { %v1063_v38 = vadd.f32 %v2521_v32, %v1062_v35  ;;  %v2907_v32 = vld [vmem:[%s3523_s4 + $0x60] sm:$0xff]  }
 0x3ba   : > { %v2747_v39 = vpop.f32.mrf.mxu0 }
 0x3bb   : > { %v1066_v40 = vpack.c.bf16 %v1063_v38, %v1060_v36  ;;  %v2908_v36 = vld [vmem:[%s3523_s4 + $0x28] sm:$0xff]  }
 0x3bd   : > { %v1141_v41 = vsel %vm798_vm2, %v1066_v40, 0 }
 0x3be   : > { %2757 = vmatpush3.bf16.xpose.msra.mxu0 %v1141_v41  ;;  %v2909_v41 = vld [vmem:[%s3523_s4 + $0x20] sm:$0xff]  }
 0x3bf   : > { %2768 = vmatprep.subr.bf16.mxu0 %v2974_v1 }
 0x3c5   : > { %2759 = vmatmul.mubr.msk.bf16.vlgmr.msra.gmra.mxu0 %vm798_vm2, %v999_v23 }
 0x3c6   : > { %2770 = vmatprep.mubr.msk.bf16.mxu0 %vm2975_vm0, %v2974_v1  ;;  %2769 = vmatpush3.bf16.msra.mxu0 %v1268_v26 }
 0x3c7   : > { %2780 = vmatprep.subr.bf16.mxu0 %v2974_v1 }
 0x485   : > { %v1177_v45 = vpop.f32.mrf.mxu0 }
 0x486   : > { %v1178_v46 = vadd.f32 %v2534_v44, %v1177_v45 }
 0x487   : > { %v2760_v47 = vpop.f32.mrf.mxu0 }
 0x488   : > { %v1184_v49 = vmul.f32 0.35355338, %v1178_v46 }
 0x489   : > { %v1180_v50 = vpop.f32.mrf.mxu0 }
 0x48a   : > { %v1186_v51 = vsel %vm591_vm3, -1e+30, %v1184_v49  ;;  %v1181_v52 = vadd.f32 %v2535_v48, %v1180_v50  ;;  %v2555_v49 = vld [vmem:[%s3524_s5 + $0x6] ss:$0 sm:$0xff] }
 0x48b   : > { %v2761_v53 = vpop.f32.mrf.mxu0  ;;  %v1188_v54 = vadd.f32 %v3162_v37, %v1186_v51 }
 0x48c   : > { %v1185_v55 = vmul.f32 0.35355338, %v1181_v52 }
 0x48d   : > { %v1190_v56 = vsel %vm858_vm4, %v1188_v54, -inf }
 0x48e   : > { %v1187_v57 = vsel %vm592_vm5, -1e+30, %v1185_v55  ;;  %1191 = vmax.xlane.f32.xlu0 %v1190_v56 }
 0x48f   : > { %v1189_v58 = vadd.f32 %v3162_v37, %v1187_v57 }
 0x491   : > { %v1193_v59 = vsel %vm862_vm6, %v1189_v58, -inf }
 0x492   : > { %1194 = vmax.xlane.f32.xlu1 %v1193_v59  ;;  %v2546_v59 = vld [vmem:[%s3524_s5 + $0x2] ss:$0 sm:$0xff] }
 0x517   : > { %v1192_v62 = vpop.xlane.xlu0 %1191 }
 0x518   : > { %v1196_v63 = vsub.f32 %v1188_v54, %v1192_v62 }
 0x51a   : > { %v1198_v0 = vmul.f32 1.442695, %v1196_v63 }
 0x51b   : > { %v1195_v2 = vpop.xlane.xlu1 %1194 }
 0x51c   : > { %2932 = vpow2.f32 %v1198_v0  ;;  %v1197_v3 = vsub.f32 %v1189_v58, %v1195_v2 }
 0x51e   : > { %v1200_v4 = vmul.f32 1.442695, %v1197_v3  ;;  %v2910_v3 = vld [vmem:[%s3523_s4 + $0xa8] sm:$0xff]  }
 0x520   : > { %2934 = vpow2.f32 %v1200_v4  ;;  %v2911_v4 = vld [vmem:[%s3523_s4 + $0xa0] sm:$0xff]  }
 0x529   : > { %v2933_v5 = vpop.eup %2932 }
 0x52a   : > { %v1202_v6 = vsel %vm858_vm4, %v2933_v5, 0.0 }
 0x52b   : > { %1203 = vadd.xlane.f32.xlu0 %v1202_v6 }
 0x52d   : > { %v2935_v8 = vpop.eup %2934 }
 0x52e   : > { %v1205_v9 = vsel %vm862_vm6, %v2935_v8, 0.0 }
 0x52f   : > { %1206 = vadd.xlane.f32.xlu1 %v1205_v9 }
 0x5b4   : > { %v1204_v17 = vpop.xlane.xlu0 %1203 }
 0x5b5   : > { %2936 = vrcp.f32 %v1204_v17 }
 0x5b8   : > { %v1207_v18 = vpop.xlane.xlu1 %1206 }
 0x5b9   : > { %2938 = vrcp.f32 %v1207_v18 }
 0x5c2   : > { %v2937_v19 = vpop.eup %2936 }
 0x5c3   : > { %v1210_v22 = vmul.f32 %v2937_v19, %v2933_v5  ;;  %v2568_v5 = vld [vmem:[%s3145_s26 + $0x20] sm:$0xff] }
 0x5c6   : > { %v2939_v20 = vpop.eup %2938 }
 0x5c7   : > { %v1211_v23 = vmul.f32 %v2939_v20, %v2935_v8 }
 0x5c9   : > { %v1212_v25 = vpack.c.bf16 %v1211_v23, %v1210_v22 }
 0x5cb   : > { %2765 = vmatmul.mubr.msk.bf16.vlgmr.msra.gmra.mxu1 %vm858_vm4, %v1212_v25 }
 0x5cc   : > { %2775 = vmatpush3.bf16.msra.mxu1 %v1315_v28  ;;  %2776 = vmatprep.mubr.msk.bf16.mxu1 %vm2975_vm0, %v2974_v1 }
 0x5cd   : > { %2788 = vmatprep.subr.bf16.mxu1 %v2974_v1 }
 0x5d3   : > { %2777 = vmatmul.mubr.msk.bf16.vlgmr.msra.gmra.mxu1 %vm798_vm2, %v931_v27 }
 0x5d4   : > { %2789 = vmatpush3.bf16.msra.mxu1 %v2906_v31  ;;  %2792 = vmatprep.mubr.msk.bf16.mxu1 %vm2975_vm0, %v2974_v1 }
 0x5d5   : > { %2790 = vmatprep.subr.bf16.mxu1 %v2974_v1 }
 0x5d8   : > { %2791 = vmatpush3.bf16.msra.mxu1 %v2907_v32 }
 0x5d9   : > { %2804 = vmatprep.subr.bf16.mxu1 %v2974_v1 }
 0x5db   : > { %2793 = vmatmul.mubr.msk.bf16.vlgmr.msra.gmra.mxu1 %vm616_vm1, %v3108_v7 }
 0x5dc   : > { %2806 = vmatprep.mubr.msk.bf16.mxu1 %vm2975_vm0, %v2974_v1 }
 0x68b   : > { %v1253_v27 = vpop.f32.mrf.mxu1 }
 0x68d   : > { %v2766_v33 = vpop.f32.mrf.mxu1 }
 0x68f   : > { %v1256_v35 = vpop.f32.mrf.mxu1 }
 0x690   : > { %v1260_v38 = vpack.c.bf16 %v1256_v35, %v1253_v27  ;;  %v2564_v35 = vld [vmem:[%s3524_s5 + $0xa] ss:$0 sm:$0xff] }
 0x691   : > { %v2767_v39 = vpop.f32.mrf.mxu1 }
 0x692   : > { %2771 = vmatmul.mubr.msk.bf16.vlgmr.msra.gmra.mxu0 %vm798_vm2, %v1260_v38 }
 0x693   : > { %v3293_v40 = vpop.f32.mrf.mxu1  ;;  %2781 = vmatpush3.bf16.msra.mxu0 %v2908_v36  ;;  %2784 = vmatprep.mubr.msk.bf16.mxu0 %vm2975_vm0, %v2974_v1 }
 0x694   : > { %2782 = vmatprep.subr.bf16.mxu0 %v2974_v1 }
 0x695   : > { %v2778_v42 = vpop.f32.mrf.mxu1 }
 0x697   : > { %v3301_v43 = vpop.f32.mrf.mxu1  ;;  %2783 = vmatpush3.bf16.msra.mxu0 %v2909_v41 }
 0x698   : > { %2796 = vmatprep.subr.bf16.mxu0 %v2974_v1 }
 0x699   : > { %v2779_v44 = vpop.f32.mrf.mxu1 }
 0x69a   : > { %2785 = vmatmul.mubr.msk.bf16.vlgmr.msra.gmra.mxu0 %vm616_vm1, %v3108_v7 }
 0x69b   : > { %v1484_v45 = vpop.f32.mrf.mxu1  ;;  %2800 = vmatprep.mubr.msk.bf16.mxu0 %vm2975_vm0, %v2974_v1  ;;  %2797 = vmatpush3.bf16.msra.mxu0 %v2910_v3  ;;  %v2914_v3 = vld [vmem:[%s3523_s4 + $0x70] sm:$0xff]  }
 0x69c   : > { %v1485_v50 = vadd.f32 %v2555_v49, %v1484_v45  ;;  %2798 = vmatprep.subr.bf16.mxu0 %v2974_v1 }
 0x69d   : > { %v2794_v46 = vpop.f32.mrf.mxu1 }
 0x69f   : > { %v1487_v47 = vpop.f32.mrf.mxu1  ;;  %2799 = vmatpush3.bf16.msra.mxu0 %v2911_v4  ;;  %v2579_v4 = vld [vmem:[%s3524_s5 + $0x3] ss:$0 sm:$0xff] }
 0x6a0   : > { %v1488_v51 = vadd.f32 %v2555_v49, %v1487_v47  ;;  %2810 = vmatprep.subr.bf16.mxu0 %v2974_v1 }
 0x6a1   : > { %v2795_v48 = vpop.f32.mrf.mxu1 }
 0x6a2   : > { %v1491_v52 = vpack.c.bf16 %v1488_v51, %v1485_v50  ;;  %2801 = vmatmul.mubr.msk.bf16.vlgmr.msra.gmra.mxu0 %vm616_vm1, %v3108_v7 }
 0x6a3   : > { %2812 = vmatprep.mubr.msk.bf16.mxu0 %vm2975_vm0, %v2974_v1 }
 0x6a4   : > { %v1566_v53 = vsel %vm798_vm2, %v1491_v52, 0 }
 0x6a5   : > { %2805 = vmatpush3.bf16.xpose.msra.mxu1 %v1566_v53 }
 0x6a6   : > { %2816 = vmatprep.subr.bf16.mxu1 %v2974_v1 }
 0x752   : > { %v3313_v54 = vpop.f32.mrf.mxu0 }
 0x754   : > { %v2772_v55 = vpop.f32.mrf.mxu0 }
 0x755   : > { %v2572_v55 = vld [vmem:[%s3525_s6 + $0x8] sm:$0xf] }
 0x756   : > { %v3315_v56 = vpop.f32.mrf.mxu0 }
 0x758   : > { %v2773_v57 = vpop.f32.mrf.mxu0 }
 0x759   : > { %v1692_v57 = vsel %vm1266_vm8, %v2572_v55, 0 }
 0x75a   : > { %v1417_v58 = vpop.f32.mrf.mxu0 }
 0x75b   : > { %v1418_v62 = vadd.f32 %v2546_v59, %v1417_v58  ;;  %v2913_v58 = vld [vmem:[%s3523_s4 + $0x38] sm:$0xff]  }
 0x75c   : > { %v2786_v60 = vpop.f32.mrf.mxu0 }
 0x75e   : > { %v1420_v61 = vpop.f32.mrf.mxu0 }
 0x75f   : > { %v1421_v63 = vadd.f32 %v2546_v59, %v1420_v61  ;;  %v2915_v59 = vld [vmem:[%s3523_s4 + $0x30] sm:$0xff]  }
 0x760   : > { %v2787_v0 = vpop.f32.mrf.mxu0 }
 0x761   : > { %v1424_v2 = vpack.c.bf16 %v1421_v63, %v1418_v62  ;;  %v2912_v63 = vld [vmem:[%s3523_s4 + $0x78] sm:$0xff]  }
 0x762   : > { %v1551_v36 = vpop.f32.mrf.mxu0 }
 0x763   : > { %2807 = vmatmul.mubr.msk.bf16.vlgmr.msra.gmra.mxu1 %vm798_vm2, %v1424_v2  ;;  %v1552_v39 = vadd.f32 %v2564_v35, %v1551_v36 }
 0x764   : > { %2818 = vmatprep.mubr.msk.bf16.mxu1 %vm2975_vm0, %v2974_v1  ;;  %v2802_v38 = vpop.f32.mrf.mxu0  ;;  %2817 = vmatpush3.bf16.msra.mxu1 %v1692_v57 }
 0x765   : > { %2830 = vmatprep.subr.bf16.mxu1 %v2974_v1 }
 0x766   : > { %v1554_v41 = vpop.f32.mrf.mxu0 }
 0x767   : > { %v1555_v42 = vadd.f32 %v2564_v35, %v1554_v41  ;;  %v2602_v35 = vld [vmem:[%s3145_s26 + $0x38] sm:$0x3] }
 0x768   : > { %v2803_v44 = vpop.f32.mrf.mxu0 }
 0x769   : > { %v1558_v45 = vpack.c.bf16 %v1555_v42, %v1552_v39 }
 0x76b   : > { %v1642_v46 = vsel %vm886_vm7, %v1558_v45, 0 }
 0x76c   : > { %2811 = vmatpush3.bf16.msra.mxu0 %v1642_v46 }
 0x76d   : > { %2822 = vmatprep.subr.bf16.mxu0 %v2974_v1 }
 0x823   : > { %v1602_v6 = vpop.f32.mrf.mxu1 }
 0x824   : > { %v1603_v8 = vadd.f32 %v2568_v5, %v1602_v6 }
 0x825   : > { %v2808_v9 = vpop.f32.mrf.mxu1 }
 0x826   : > { %v1609_v11 = vmul.f32 0.35355338, %v1603_v8 }
 0x827   : > { %v1605_v12 = vpop.f32.mrf.mxu1 }
 0x828   : > { %v1611_v13 = vsel %vm591_vm3, -1e+30, %v1609_v11  ;;  %v1606_v14 = vadd.f32 %v2569_v10, %v1605_v12 }
 0x829   : > { %v2809_v15 = vpop.f32.mrf.mxu1  ;;  %v1613_v16 = vadd.f32 %v3162_v37, %v1611_v13  ;;  %v1352_v13 = vadd.f32 %v3293_v40, %v3313_v54 }
 0x82a   : > { %v1610_v17 = vmul.f32 0.35355338, %v1606_v14 }
 0x82b   : > { %v1615_v18 = vsel %vm858_vm4, %v1613_v16, -inf }
 0x82c   : > { %v1612_v19 = vsel %vm592_vm5, -1e+30, %v1610_v17  ;;  %1616 = vmax.xlane.f32.xlu0 %v1615_v18  ;;  %v1355_v17 = vadd.f32 %v3301_v43, %v3315_v56  ;;  %v2916_v43 = vld [vmem:[%s3523_s4 + $0xb8] sm:$0xff]   ;;  %v2917_v56 = vld [vmem:[%s3523_s4 + $0xb0] sm:$0xff]  }
 0x82d   : > { %v1614_v20 = vadd.f32 %v3162_v37, %v1612_v19 }
 0x82f   : > { %v1618_v21 = vsel %vm862_vm6, %v1614_v20, -inf }
 0x830   : > { %1619 = vmax.xlane.f32.xlu1 %v1618_v21 }
 0x8b5   : > { %v1617_v22 = vpop.xlane.xlu0 %1616 }
 0x8b6   : > { %v1621_v23 = vsub.f32 %v1613_v16, %v1617_v22  ;;  %v2588_v22 = vld [vmem:[%s3524_s5 + $0x7] ss:$0 sm:$0xff] }
 0x8b8   : > { %v1623_v25 = vmul.f32 1.442695, %v1621_v23 }
 0x8b9   : > { %v1620_v28 = vpop.xlane.xlu1 %1619 }
 0x8ba   : > { %2940 = vpow2.f32 %v1623_v25  ;;  %v1622_v31 = vsub.f32 %v1614_v20, %v1620_v28 }
 0x8bc   : > { %v1625_v32 = vmul.f32 1.442695, %v1622_v31 }
 0x8be   : > { %2942 = vpow2.f32 %v1625_v32 }
 0x8c7   : > { %v2941_v24 = vpop.eup %2940 }
 0x8c8   : > { %v1627_v26 = vsel %vm858_vm4, %v2941_v24, 0.0 }
 0x8c9   : > { %1628 = vadd.xlane.f32.xlu0 %v1627_v26 }
 0x8cb   : > { %v2943_v27 = vpop.eup %2942 }
 0x8cc   : > { %v1630_v33 = vsel %vm862_vm6, %v2943_v27, 0.0 }
 0x8cd   : > { %1631 = vadd.xlane.f32.xlu1 %v1630_v33 }
 0x952   : > { %v1629_v47 = vpop.xlane.xlu0 %1628 }
 0x953   : > { %2944 = vrcp.f32 %v1629_v47 }
 0x956   : > { %v1632_v48 = vpop.xlane.xlu1 %1631 }
 0x957   : > { %2946 = vrcp.f32 %v1632_v48 }
 0x960   : > { %v2945_v49 = vpop.eup %2944 }
 0x961   : > { %v1635_v51 = vmul.f32 %v2945_v49, %v2941_v24  ;;  %v2601_v24 = vld [vmem:[%s3145_s26 + $0x30] sm:$0xff]  ;;  %s575_s26 = scalar_lea.vmem %s3522_s3, %s3096_s17 }
 0x964   : > { %v2947_v50 = vpop.eup %2946 }
 0x965   : > { %v1636_v52 = vmul.f32 %v2947_v50, %v2943_v27 }
 0x967   : > { %v1637_v53 = vpack.c.bf16 %v1636_v52, %v1635_v51 }
 0x969   : > { %2813 = vmatmul.mubr.msk.bf16.vlgmr.msra.gmra.mxu0 %vm858_vm4, %v1637_v53 }
 0x96a   : > { %2826 = vmatprep.mubr.msk.bf16.mxu0 %vm2975_vm0, %v2974_v1  ;;  %2823 = vmatpush3.bf16.msra.mxu0 %v2913_v58 }
 0x96b   : > { %2824 = vmatprep.subr.bf16.mxu0 %v2974_v1 }
 0x96e   : > { %2825 = vmatpush3.bf16.msra.mxu0 %v2915_v59 }
 0x96f   : > { %2838 = vmatprep.subr.bf16.mxu0 %v2974_v1 }
 0x971   : > { %2827 = vmatmul.mubr.msk.bf16.vlgmr.msra.gmra.mxu0 %vm616_vm1, %v3108_v7 }
 0x972   : > { %2842 = vmatprep.mubr.msk.bf16.mxu0 %vm2975_vm0, %v2974_v1  ;;  %2839 = vmatpush3.bf16.msra.mxu0 %v2916_v43 }
 0x973   : > { %2840 = vmatprep.subr.bf16.mxu0 %v2974_v1 }
 0x976   : > { %2841 = vmatpush3.bf16.msra.mxu0 %v2917_v56 }
 0x977   : > { %2852 = vmatprep.subr.bf16.mxu0 %v2974_v1 }
 0x979   : > { %2843 = vmatmul.mubr.msk.bf16.vlgmr.msra.gmra.mxu0 %vm616_vm1, %v3108_v7 }
 0x97a   : > { %2854 = vmatprep.mubr.msk.bf16.mxu0 %vm2975_vm0, %v2974_v1 }
 0xa29   : > { %v1678_v60 = vpop.f32.mrf.mxu0 }
 0xa2b   : > { %v2814_v61 = vpop.f32.mrf.mxu0 }
 0xa2d   : > { %v1681_v62 = vpop.f32.mrf.mxu0 }
 0xa2e   : > { %v1685_v0 = vpack.c.bf16 %v1681_v62, %v1678_v60 }
 0xa2f   : > { %v2815_v2 = vpop.f32.mrf.mxu0 }
 0xa30   : > { %2819 = vmatmul.mubr.msk.bf16.vlgmr.msra.gmra.mxu1 %vm798_vm2, %v1685_v0 }
 0xa31   : > { %2831 = vmatpush3.bf16.msra.mxu1 %v2912_v63  ;;  %2834 = vmatprep.mubr.msk.bf16.mxu1 %vm2975_vm0, %v2974_v1  ;;  %v1796_v5 = vpop.f32.mrf.mxu0 }
 0xa32   : > { %2832 = vmatprep.subr.bf16.mxu1 %v2974_v1  ;;  %v1797_v8 = vadd.f32 %v2579_v4, %v1796_v5 }
 0xa33   : > { %v2828_v6 = vpop.f32.mrf.mxu0 }
 0xa35   : > { %2833 = vmatpush3.bf16.msra.mxu1 %v2914_v3  ;;  %v1799_v9 = vpop.f32.mrf.mxu0 }
 0xa36   : > { %2846 = vmatprep.subr.bf16.mxu1 %v2974_v1  ;;  %v1800_v10 = vadd.f32 %v2579_v4, %v1799_v9 }
 0xa37   : > { %v2829_v11 = vpop.f32.mrf.mxu0 }
 0xa38   : > { %2835 = vmatmul.mubr.msk.bf16.vlgmr.msra.gmra.mxu1 %vm616_vm1, %v3108_v7  ;;  %v1803_v12 = vpack.c.bf16 %v1800_v10, %v1797_v8  ;;  %v2605_v11 = vld [vmem:[%s3525_s6 + $0xc] sm:$0xf] }
 0xa39   : > { %2848 = vmatprep.mubr.msk.bf16.mxu1 %vm2975_vm0, %v2974_v1  ;;  %v1930_v58 = vpop.f32.mrf.mxu0 }
 0xa3b   : > { %v2844_v59 = vpop.f32.mrf.mxu0 }
 0xa3d   : > { %v1933_v61 = vpop.f32.mrf.mxu0 }
 0xa3f   : > { %v2845_v63 = vpop.f32.mrf.mxu0 }
 0xa40   : > { %v2922_v63 = vld [vmem:[%s3531_s12 + $0x8] sm:$0xff]  }
 0xaf0   : > { %v1728_v14 = vpop.f32.mrf.mxu1 }
 0xaf1   : > { %v3394_v15 = vadd.f32 %v1728_v14, %v1352_v13 }
 0xaf2   : > { %v2820_v16 = vpop.f32.mrf.mxu1 }
 0xaf4   : > { %v1731_v18 = vpop.f32.mrf.mxu1 }
 0xaf5   : > { %v3398_v19 = vadd.f32 %v1731_v18, %v1355_v17 }
 0xaf6   : > { %v2821_v20 = vpop.f32.mrf.mxu1 }
 0xaf8   : > { %v1863_v21 = vpop.f32.mrf.mxu1 }
 0xaf9   : > { %v1864_v28 = vadd.f32 %v2588_v22, %v1863_v21  ;;  %v2607_v21 = vld [vmem:[%s3526_s7] ss:$0 sm:$0xff] }
 0xafa   : > { %v2836_v23 = vpop.f32.mrf.mxu1 }
 0xafc   : > { %v1866_v25 = vpop.f32.mrf.mxu1 }
 0xafd   : > { %v1867_v40 = vadd.f32 %v2588_v22, %v1866_v25 }
 0xafe   : > { %v2837_v54 = vpop.f32.mrf.mxu1 }
 0xaff   : > { %v1870_v31 = vpack.c.bf16 %v1867_v40, %v1864_v28  ;;  %v2964_v54 = vld [vmem:[%s3102_s23] sm:$0xff] }
 0xb01   : > { %v1945_v32 = vsel %vm798_vm2, %v1870_v31, 0 }
 0xb02   : > { %2847 = vmatpush3.bf16.xpose.msra.mxu1 %v1945_v32 }
 0xb03   : > { %2858 = vmatprep.subr.bf16.mxu1 %v2974_v1 }
 0xb09   : > { %2849 = vmatmul.mubr.msk.bf16.vlgmr.msra.gmra.mxu1 %vm798_vm2, %v1803_v12  ;;  %v2071_v12 = vsel %vm1266_vm8, %v2605_v11, 0 }
 0xb0a   : > { %2860 = vmatprep.mubr.msk.bf16.mxu1 %vm2975_vm0, %v2974_v1  ;;  %2859 = vmatpush3.bf16.msra.mxu1 %v2071_v12 }
 0xb0b   : > { %2872 = vmatprep.subr.bf16.mxu1 %v2974_v1 }
 0xbc9   : > { %v1981_v26 = vpop.f32.mrf.mxu1 }
 0xbca   : > { %v1982_v27 = vadd.f32 %v2601_v24, %v1981_v26  ;;  %v2965_v24 = vld [vmem:[%s3102_s23 + $0x8] sm:$0x3] }
 0xbcb   : > { %v2850_v33 = vpop.f32.mrf.mxu1 }
 0xbcc   : > { %v1988_v36 = vmul.f32 0.35355338, %v1982_v27 }
 0xbcd   : > { %v1984_v38 = vpop.f32.mrf.mxu1 }
 0xbce   : > { %v1990_v39 = vsel %vm591_vm3, -1e+30, %v1988_v36  ;;  %v1985_v41 = vadd.f32 %v2602_v35, %v1984_v38 }
 0xbcf   : > { %v2851_v42 = vpop.f32.mrf.mxu1  ;;  %v1992_v44 = vadd.f32 %v3162_v37, %v1990_v39 }
 0xbd0   : > { %v1989_v45 = vmul.f32 0.35355338, %v1985_v41 }
 0xbd1   : > { %v1994_v7 = vsel %vm858_vm4, %v1992_v44, -inf }
 0xbd2   : > { %v1991_v46 = vsel %vm592_vm5, -1e+30, %v1989_v45  ;;  %1995 = vmax.xlane.f32.xlu0 %v1994_v7  ;;  %v2918_v45 = vld [vmem:[%s3529_s10 + $0x8] sm:$0xff]   ;;  %v2919_v7 = vld [vmem:[%s3529_s10] sm:$0xff]  }
 0xbd3   : > { %v1993_v47 = vadd.f32 %v3162_v37, %v1991_v46  ;;  %v2597_v37 = vld [vmem:[%s3524_s5 + $0xb] ss:$0 sm:$0xff]  ;;  %v2920_v46 = vld [vmem:[%s3531_s12 + $0x18] sm:$0xff]  }
 0xbd4   : > { %v1931_v60 = vadd.f32 %v2597_v37, %v1930_v58  ;;  %v1934_v62 = vadd.f32 %v2597_v37, %v1933_v61  ;;  %v2609_v37 = vld [vmem:[%s3528_s9] ss:$0 sm:$0xff] }
 0xbd5   : > { %v1997_v48 = vsel %vm862_vm6, %v1993_v47, -inf }
 0xbd6   : > { %1998 = vmax.xlane.f32.xlu1 %v1997_v48  ;;  %v1937_v0 = vpack.c.bf16 %v1934_v62, %v1931_v60  ;;  %v2921_v62 = vld [vmem:[%s3531_s12 + $0x10] sm:$0xff]  }
 0xbd8   : > { %v2021_v2 = vsel %vm886_vm7, %v1937_v0, 0  ;;  %v2923_v0 = vld [vmem:[%s3531_s12] sm:$0xff]  }
 0xbd9   : > { %2853 = vmatpush3.bf16.msra.mxu0 %v2021_v2  ;;  %v2610_v2 = vld [vmem:[%s3530_s11] ss:$0 sm:$0xff] }
 0xbda   : > { %2864 = vmatprep.subr.bf16.mxu0 %v2974_v1 }
 0xc5b   : > { %v1996_v49 = vpop.xlane.xlu0 %1995 }
 0xc5c   : > { %v2000_v29 = vsub.f32 %v1992_v44, %v1996_v49 }
 0xc5e   : > { %v2002_v50 = vmul.f32 1.442695, %v2000_v29 }
 0xc5f   : > { %v1999_v51 = vpop.xlane.xlu1 %1998 }
 0xc60   : > { %2948 = vpow2.f32 %v2002_v50  ;;  %v2001_v52 = vsub.f32 %v1993_v47, %v1999_v51 }
 0xc62   : > { %v2004_v53 = vmul.f32 1.442695, %v2001_v52 }
 0xc64   : > { %2950 = vpow2.f32 %v2004_v53 }
 0xc6d   : > { %v2949_v55 = vpop.eup %2948 }
 0xc6e   : > { %v2006_v57 = vsel %vm858_vm4, %v2949_v55, 0.0 }
 0xc6f   : > { %2007 = vadd.xlane.f32.xlu0 %v2006_v57 }
 0xc71   : > { %v2951_v30 = vpop.eup %2950 }
 0xc72   : > { %v2009_v34 = vsel %vm862_vm6, %v2951_v30, 0.0 }
 0xc73   : > { %2010 = vadd.xlane.f32.xlu1 %v2009_v34 }
 0xcf8   : > { %v2008_v3 = vpop.xlane.xlu0 %2007 }
 0xcf9   : > { %2952 = vrcp.f32 %v2008_v3 }
 0xcfc   : > { %v2011_v4 = vpop.xlane.xlu1 %2010 }
 0xcfd   : > { %2954 = vrcp.f32 %v2011_v4 }
 0xd06   : > { %v2953_v5 = vpop.eup %2952 }
 0xd07   : > { %v2014_v8 = vmul.f32 %v2953_v5, %v2949_v55  ;;  %v2608_v55 = vld [vmem:[%s3527_s8] ss:$0 sm:$0xff] }
 0xd0a   : > { %v2955_v6 = vpop.eup %2954 }
 0xd0b   : > { %v2015_v9 = vmul.f32 %v2955_v6, %v2951_v30 }
 0xd0d   : > { %v2016_v10 = vpack.c.bf16 %v2015_v9, %v2014_v8 }
 0xd0f   : > { %2855 = vmatmul.mubr.msk.bf16.vlgmr.msra.gmra.mxu0 %vm858_vm4, %v2016_v10  ;;  %v2244_v10 = vld [vmem:[%s575_s26 + $0x8] sm:$0x3] }
 0xd10   : > { %2868 = vmatprep.mubr.msk.bf16.mxu0 %vm2975_vm0, %v2974_v1  ;;  %2865 = vmatpush3.bf16.msra.mxu0 %v2918_v45 }
 0xd11   : > { %2866 = vmatprep.subr.bf16.mxu0 %v2974_v1 }
 0xd14   : > { %2867 = vmatpush3.bf16.msra.mxu0 %v2919_v7  ;;  %v2620_v7 = vld [vmem:[%s3533_s14] ss:$0 sm:$0xff] }
 0xdcf   : > { %v2057_v13 = vpop.f32.mrf.mxu0 }
 0xdd1   : > { %v2856_v14 = vpop.f32.mrf.mxu0 }
 0xdd3   : > { %v2060_v16 = vpop.f32.mrf.mxu0 }
 0xdd4   : > { %v2064_v17 = vpack.c.bf16 %v2060_v16, %v2057_v13 }
 0xdd5   : > { %v2857_v18 = vpop.f32.mrf.mxu0 }
 0xdd6   : > { %2861 = vmatmul.mubr.msk.bf16.vlgmr.msra.gmra.mxu1 %vm798_vm2, %v2064_v17  ;;  %v2614_v17 = vld [vmem:[%s3532_s13] ss:$0 sm:$0xff] }
 0xdd7   : > { %2880 = vmatprep.mubr.msk.bf16.mxu1 %vm2975_vm0, %v2974_v1  ;;  %2873 = vmatpush3.bf16.msra.mxu1 %v2920_v46 }
 0xdd8   : > { %2874 = vmatprep.subr.bf16.mxu1 %v2974_v1 }
 0xddb   : > { %2875 = vmatpush3.bf16.msra.mxu1 %v2921_v62 }
 0xddc   : > { %2876 = vmatprep.subr.bf16.mxu1 %v2974_v1 }
 0xddf   : > { %2877 = vmatpush3.bf16.msra.mxu1 %v2922_v63 }
 0xde0   : > { %2878 = vmatprep.subr.bf16.mxu1 %v2974_v1  ;;  %v2243_v1 = vld [vmem:[%s575_s26] sm:$0xff] }
 0xde3   : > { %2879 = vmatpush3.bf16.msra.mxu1 %v2923_v0 }
 0xe96   : > { %v2107_v20 = vpop.f32.mrf.mxu1 }
 0xe97   : > { %v2114_v22 = vadd.f32 %v2107_v20, %v3394_v15 }
 0xe98   : > { %v2862_v23 = vpop.f32.mrf.mxu1 }
 0xe99   : > { %v2123_v25 = vadd.f32 %v2607_v21, %v2114_v22 }
 0xe9a   : > { %v2110_v28 = vpop.f32.mrf.mxu1 }
 0xe9b   : > { %v2115_v40 = vadd.f32 %v2110_v28, %v3398_v19  ;;  %v2125_v31 = vadd.f32 %v2964_v54, %v2123_v25 }
 0xe9c   : > { %v2863_v32 = vpop.f32.mrf.mxu1 }
 0xe9d   : > { %v2124_v43 = vadd.f32 %v2607_v21, %v2115_v40  ;;  %v2129_v56 = vsel %vm616_vm1, %v2125_v31, 0.0 }
 0xe9e   : > { %2130 = vadd.xlane.f32.xlu0 %v2129_v56 }
 0xe9f   : > { %v2126_v26 = vadd.f32 %v2965_v24, %v2124_v43 }
 0xea1   : > { %v2133_v27 = vsel %vm2132_vm9, %v2126_v26, 0.0 }
 0xea2   : > { %2134 = vadd.xlane.f32.xlu1 %v2133_v27 }
 0xf27   : > { %v2131_v33 = vpop.xlane.xlu0 %2130 }
 0xf28   : > { %v2137_v15 = vmul.f32 0.03125, %v2131_v33 }
 0xf2a   : > { %v2139_v35 = vsub.f32 %v2125_v31, %v2137_v15 }
 0xf2b   : > { %v2135_v36 = vpop.xlane.xlu1 %2134 }
 0xf2c   : > { %v2138_v38 = vmul.f32 0.03125, %v2135_v36  ;;  %v2141_v39 = vmul.f32 %v2139_v35, %v2139_v35 }
 0xf2e   : > { %v2140_v19 = vsub.f32 %v2126_v26, %v2138_v38  ;;  %v2143_v41 = vsel %vm616_vm1, %v2141_v39, 0.0 }
 0xf2f   : > { %2144 = vadd.xlane.f32.xlu0 %v2143_v41 }
 0xf30   : > { %v2142_v42 = vmul.f32 %v2140_v19, %v2140_v19 }
 0xf32   : > { %v2146_v44 = vsel %vm2132_vm9, %v2142_v42, 0.0 }
 0xf33   : > { %2147 = vadd.xlane.f32.xlu1 %v2146_v44 }
 0xfb8   : > { %v2145_v47 = vpop.xlane.xlu0 %2144 }
 0xfb9   : > { %v2149_v48 = vmul.f32 0.03125, %v2145_v47  ;;  %v2621_v47 = vld [vmem:[%s3534_s15] ss:$0 sm:$0xff] }
 0xfbb   : > { %v2151_v49 = vadd.f32 1e-06, %v2149_v48 }
 0xfbc   : > { %v2148_v29 = vpop.xlane.xlu1 %2147 }
 0xfbd   : > { %2956 = vrsqrt.f32 %v2151_v49  ;;  %v2150_v50 = vmul.f32 0.03125, %v2148_v29 }
 0xfbf   : > { %v2152_v51 = vadd.f32 1e-06, %v2150_v50 }
 0xfc1   : > { %2958 = vrsqrt.f32 %v2152_v51 }
 0xfca   : > { %v2957_v52 = vpop.eup %2956 }
 0xfcb   : > { %v2155_v53 = vmul.f32 %v2957_v52, %v2139_v35 }
 0xfcd   : > { %v2163_v34 = vmul.f32 %v2608_v55, %v2155_v53 }
 0xfce   : > { %v2959_v57 = vpop.eup %2958 }
 0xfcf   : > { %v2156_v30 = vmul.f32 %v2959_v57, %v2140_v19  ;;  %v2171_v59 = vadd.f32 %v2609_v37, %v2163_v34 }
 0xfd1   : > { %v2164_v58 = vmul.f32 %v2608_v55, %v2156_v30 }
 0xfd3   : > { %v2172_v60 = vadd.f32 %v2609_v37, %v2164_v58 }
 0xfd5   : > { %v2173_v61 = vpack.c.bf16 %v2172_v60, %v2171_v59 }
 0xfd7   : > { %2869 = vmatmul.mubr.msk.bf16.vlgmr.msra.gmra.mxu0 %vm616_vm1, %v2173_v61 }
0x1097   : > { %v2234_v3 = vpop.f32.mrf.mxu0 }
0x1098   : > { %v2235_v4 = vadd.f32 %v2610_v2, %v2234_v3 }
0x1099   : > { %v2870_v5 = vpop.f32.mrf.mxu0 }
0x109a   : > { %v2241_v8 = vmax.f32 %v2235_v4, 0.0 }
0x109b   : > { %v2237_v6 = vpop.f32.mrf.mxu0 }
0x109c   : > { %v2238_v9 = vadd.f32 %v2610_v2, %v2237_v6  ;;  %v2245_v13 = vadd.f32 %v2243_v1, %v2241_v8 }
0x109d   : > { %v2871_v11 = vpop.f32.mrf.mxu0 }
0x109e   : > { %v2242_v12 = vmax.f32 %v2238_v9, 0.0 }
0x10a0   : > { %v2246_v14 = vadd.f32 %v2244_v10, %v2242_v12 }
0x10a2   : > { %v2247_v16 = vpack.c.bf16 %v2246_v14, %v2245_v13 }
0x10a4   : > { %2881 = vmatmul.mubr.msk.bf16.vlgmr.msra.gmra.mxu1 %vm2287_vm10, %v2247_v16 }
0x1164   : > { %v2325_v18 = vpop.f32.mrf.mxu1 }
0x1165   : > { %v2326_v20 = vadd.f32 %v2614_v17, %v2325_v18 }
0x1166   : > { %v2882_v21 = vpop.f32.mrf.mxu1 }
0x1167   : > { %v2332_v22 = vadd.f32 %v2326_v20, %v2171_v59 }
0x1168   : > { %v2328_v23 = vpop.f32.mrf.mxu1 }
0x1169   : > { %v2329_v25 = vadd.f32 %v2614_v17, %v2328_v23  ;;  %v2336_v28 = vsel %vm616_vm1, %v2332_v22, 0.0 }
0x116a   : > { %2337 = vadd.xlane.f32.xlu0 %v2336_v28  ;;  %v2883_v40 = vpop.f32.mrf.mxu1 }
0x116b   : > { %v2333_v54 = vadd.f32 %v2329_v25, %v2172_v60 }
0x116d   : > { %v2339_v31 = vsel %vm2132_vm9, %v2333_v54, 0.0 }
0x116e   : > { %2340 = vadd.xlane.f32.xlu1 %v2339_v31 }
0x11f3   : > { %v2338_v32 = vpop.xlane.xlu0 %2337 }
0x11f4   : > { %v2342_v43 = vmul.f32 0.03125, %v2338_v32 }
0x11f6   : > { %v2344_v56 = vsub.f32 %v2332_v22, %v2342_v43 }
0x11f7   : > { %v2341_v24 = vpop.xlane.xlu1 %2340 }
0x11f8   : > { %v2343_v26 = vmul.f32 0.03125, %v2341_v24  ;;  %v2346_v27 = vmul.f32 %v2344_v56, %v2344_v56 }
0x11fa   : > { %v2345_v33 = vsub.f32 %v2333_v54, %v2343_v26  ;;  %v2348_v15 = vsel %vm616_vm1, %v2346_v27, 0.0 }
0x11fb   : > { %2349 = vadd.xlane.f32.xlu0 %v2348_v15 }
0x11fc   : > { %v2347_v35 = vmul.f32 %v2345_v33, %v2345_v33 }
0x11fe   : > { %v2351_v36 = vsel %vm2132_vm9, %v2347_v35, 0.0 }
0x11ff   : > { %2352 = vadd.xlane.f32.xlu1 %v2351_v36 }
0x1284   : > { %v2350_v38 = vpop.xlane.xlu0 %2349 }
0x1285   : > { %v2354_v39 = vmul.f32 0.03125, %v2350_v38 }
0x1287   : > { %v2356_v19 = vadd.f32 1e-06, %v2354_v39 }
0x1288   : > { %v2353_v41 = vpop.xlane.xlu1 %2352 }
0x1289   : > { %2960 = vrsqrt.f32 %v2356_v19  ;;  %v2355_v42 = vmul.f32 0.03125, %v2353_v41 }
0x128b   : > { %v2357_v44 = vadd.f32 1e-06, %v2355_v42 }
0x128d   : > { %2962 = vrsqrt.f32 %v2357_v44 }
0x1296   : > { %v2961_v45 = vpop.eup %2960 }
0x1297   : > { %v2360_v46 = vmul.f32 %v2961_v45, %v2344_v56 }
0x1299   : > { %v2368_v48 = vmul.f32 %v2620_v7, %v2360_v46 }
0x129a   : > { %v2963_v49 = vpop.eup %2962 }
0x129b   : > { %v2376_v29 = vadd.f32 %v2621_v47, %v2368_v48  ;;  %v2361_v50 = vmul.f32 %v2963_v49, %v2345_v33 }
0x129d   : > { %2378 = vst.msk [vmem:[%s580_s29] sm:$0xff] %vm616_vm1, %v2376_v29  ;;  %v2369_v51 = vmul.f32 %v2620_v7, %v2361_v50 }
0x129f   : > { %v2377_v52 = vadd.f32 %v2621_v47, %v2369_v51 }
0x12a1   : > { %2379 = vst.msk [vmem:[%s580_s29 + $0x8] sm:$0x3] %vm2132_vm9, %v2377_v52 }
0x12a2 PF: > { %s26_s21 = sadd.s32 1, %s2972_s21  }
0x12a3   : > { %p23_p5 = scmp.ge.s32.totalorder %s26_s21, 4  }
0x12a5   :  { %25 = sbr.rel (!%p23_p5) target bundleno = 2 (0x2), region = 151 }

</bundles_post_ra>
